<compile_context>
chip_gen: v7x
topology: tpu7x:2x2x1
jax: 0.10.0
libtpu: 0.0.40
codegen_flags: <defaults>
</compile_context>

<pallas_src>
import functools

import numpy as np

import jax
import jax.numpy as jnp
from jax.experimental import pallas as pl
from jax.experimental.pallas import tpu as pltpu


# ----------------------------------------------------------------------------
# Parameter / glue helpers (plain JAX)
# ----------------------------------------------------------------------------
def calculate_laplacian_with_self_loop(adj):
    a = adj + jnp.eye(adj.shape[0], dtype=adj.dtype)
    row_sum = a.sum(1)
    d_inv_sqrt = jnp.power(row_sum, -0.5)
    d_inv_sqrt = jnp.where(jnp.isinf(d_inv_sqrt), 0.0, d_inv_sqrt)
    d = jnp.diag(d_inv_sqrt)
    return (a @ d).T @ d


# ----------------------------------------------------------------------------
# Pallas kernel: one batch element; full T-step GRU recurrence + dense head.
# ----------------------------------------------------------------------------
def tgcn_kernel(x_ref, L_ref, sel_e_ref, sel_o_ref,
                w1x_ref, w1h_ref, b1_ref,
                w2x_ref, w2h_ref, b2_ref,
                wd_ref, bd_ref, out_ref):
    dot = functools.partial(jnp.dot, preferred_element_type=jnp.float32)

    N = L_ref.shape[0]
    T = x_ref.shape[2]
    H = w2h_ref.shape[0]

    L = L_ref[...]                         # (N, N) normalized laplacian
    xs = x_ref[0]                          # (N, T) this batch's inputs (nodes x time)
    sel_e = sel_e_ref[...]                 # (2N, N) chunk row-selector, even nodes
    sel_o = sel_o_ref[...]                 # (2N, N) chunk row-selector, odd nodes
    w1h = w1h_ref[...]                     # (H, 2H)
    w2h = w2h_ref[...]                     # (H, H)

    # Hoisted out of the time loop: graph conv of the input for *all* steps in
    # one MXU push, and sublane-broadcasts of the (1, .) parameters.
    ax_all = dot(L, xs)                                    # (N, T) = [L @ x_t]_t
    w1x = jnp.broadcast_to(w1x_ref[...], (N, 2 * H))
    b1 = jnp.broadcast_to(b1_ref[...], (N, 2 * H))
    w2x = jnp.broadcast_to(w2x_ref[...], (N, H))
    b2 = jnp.broadcast_to(b2_ref[...], (N, H))

    h = jnp.zeros((N, H), jnp.float32)
    for t in range(T):                     # fully unrolled; all slices static
        ax = ax_all[:, t:t + 1]                            # (N, 1) = L @ x_t
        # ---- graph conv 1:  o1 = sigmoid((L @ [x, h]) @ W1 + b1) ----------
        o1 = jax.nn.sigmoid(ax * w1x + dot(dot(L, h), w1h) + b1)       # (N, 2H)
        # ---- torch.chunk on the flattened (N*2H,) gate vector -------------
        #   r[n,k] = o1[n//2,        (n%2)*H + k]
        #   u[n,k] = o1[N//2 + n//2, (n%2)*H + k]
        ru = dot(sel_e, o1)[:, :H] + dot(sel_o, o1)[:, H:]             # (2N, H)
        r, u = ru[:N], ru[N:]
        # ---- graph conv 2:  c = tanh((L @ [x, r*h]) @ W2 + b2) ------------
        c = jnp.tanh(ax * w2x + dot(dot(L, r * h), w2h) + b2)          # (N, H)
        # ---- GRU state update ---------------------------------------------
        h = u * h + (1.0 - u) * c

    # dense head (torch `x.relu()` is a no-op); single store per batch.
    y = dot(h, wd_ref[...]) + bd_ref[...]                  # (N, out_dim)
    out_ref[0] = y.astype(out_ref.dtype)


# ----------------------------------------------------------------------------
# Wrapper
# ----------------------------------------------------------------------------
def tgcn_regression_forward(x, adj, params):
    """x: (B, T, N) float32 -> (B, N, out_dim) float32."""
    B, T, N = x.shape
    W1, b1, W2, b2, Wd, bd = (params[k] for k in ("W1", "b1", "W2", "b2", "Wd", "bd"))
    H = W2.shape[1]
    out_dim = Wd.shape[0]
    assert N % 2 == 0, "torch.chunk-on-flattened emulation requires an even node count"

    L = calculate_laplacian_with_self_loop(adj).astype(jnp.float32)

    # Time on the last axis: one contiguous (N, T) slab DMA per batch element.
    x_nt = jnp.transpose(x.astype(jnp.float32), (0, 2, 1))   # (B, N, T)

    # Split / reshape params so the kernel only sees >=2-D tiles.
    w1x, w1h = W1[0:1, :], W1[1:, :]        # (1, 2H), (H, 2H)
    w2x, w2h = W2[0:1, :], W2[1:, :]        # (1, H),  (H, H)
    b1r, b2r = b1[None, :], b2[None, :]     # (1, 2H), (1, H)
    wdt, bdr = Wd.T, bd[None, :]            # (H, out_dim), (1, out_dim)

    # Precomputed 0/1 selectors reproducing torch.chunk on the flattened gate
    # vector: row i<N selects o1 row n//2 (-> r), row i>=N selects row
    # N//2 + n//2 (-> u); even nodes read cols [:H], odd nodes read cols [H:].
    idx = np.arange(2 * N)
    node = idx % N
    row = np.where(idx < N, node // 2, N // 2 + node // 2)
    even = node % 2 == 0
    sel_e_np = np.zeros((2 * N, N), np.float32)
    sel_o_np = np.zeros((2 * N, N), np.float32)
    sel_e_np[idx[even], row[even]] = 1.0
    sel_o_np[idx[~even], row[~even]] = 1.0
    sel_e = jnp.asarray(sel_e_np)
    sel_o = jnp.asarray(sel_o_np)

    def const(shape):
        return pl.BlockSpec(shape, lambda b: (0,) * len(shape))

    grid_spec = pltpu.PrefetchScalarGridSpec(
        num_scalar_prefetch=0,
        grid=(B,),
        in_specs=[
            pl.BlockSpec((1, N, T), lambda b: (b, 0, 0)),              # x slab
            const((N, N)),                                             # laplacian
            const((2 * N, N)), const((2 * N, N)),                      # chunk selectors
            const((1, 2 * H)), const((H, 2 * H)), const((1, 2 * H)),   # conv1
            const((1, H)), const((H, H)), const((1, H)),               # conv2
            const((H, out_dim)), const((1, out_dim)),                  # dense head
        ],
        out_specs=pl.BlockSpec((1, N, out_dim), lambda b: (b, 0, 0)),
    )

    return pl.pallas_call(
        tgcn_kernel,
        out_shape=jax.ShapeDtypeStruct((B, N, out_dim), jnp.float32),
        grid_spec=grid_spec,
        compiler_params=pltpu.CompilerParams(
            dimension_semantics=("parallel",)),
    )(x_nt, L, sel_e, sel_o, w1x, w1h, b1r, w2x, w2h, b2r, wdt, bdr)


# ----------------------------------------------------------------------------
# Pure-JAX reference (direct port of the torch T-GCN forward, incl. chunk quirk)
# ----------------------------------------------------------------------------
def tgcn_regression_reference(x, adj, params):
    B, T, N = x.shape
    W1, b1, W2, b2, Wd, bd = (params[k] for k in ("W1", "b1", "W2", "b2", "Wd", "bd"))
    H = W2.shape[1]
    L = calculate_laplacian_with_self_loop(adj).astype(jnp.float32)

    def graph_conv(inp, hidden, W, b):
        out_dim = W.shape[1]
        ngru = W.shape[0] - 1
        cat = jnp.concatenate(
            [inp.reshape(B, N, 1), hidden.reshape(B, N, ngru)], axis=2)
        cat = jnp.transpose(cat, (1, 2, 0)).reshape(N, (ngru + 1) * B)
        a = (L @ cat).reshape(N, ngru + 1, B)
        a = jnp.transpose(a, (2, 0, 1)).reshape(B * N, ngru + 1)
        o = a @ W + b
        return o.reshape(B, N * out_dim)

    h = jnp.zeros((B, N * H), jnp.float32)
    out = None
    for t in range(T):
        xt = x[:, t, :]
        conc = jax.nn.sigmoid(graph_conv(xt, h, W1, b1))
        r, u = jnp.split(conc, 2, axis=1)
        c = jnp.tanh(graph_conv(xt, r * h, W2, b2))
        h = u * h + (1.0 - u) * c
        out = h.reshape(B, N, H)
    # `x.relu()` in the torch module is not assigned -> no-op
    return out @ Wd.T + bd


# ----------------------------------------------------------------------------
if __name__ == "__main__":
    B, T, N, H, OUT = 2, 8, 16, 32, 3   # batch, seq, nodes, tgcn_hidden, out_dim

    key = jax.random.PRNGKey(0)
    ka, kx, k1, k2, k3, k4 = jax.random.split(key, 6)

    adj_rand = jax.random.uniform(ka, (N, N))
    adj = (((adj_rand + adj_rand.T) * 0.5) < 0.4).astype(jnp.float32)
    x = jax.random.normal(kx, (B, T, N), dtype=jnp.float32)

    # deterministic parameter init (shapes from TGCN/TGCNCell/Linear __init__)
    lim1 = (6.0 / ((H + 1) + 2 * H)) ** 0.5          # xavier_uniform
    lim2 = (6.0 / ((H + 1) + H)) ** 0.5
    kd = 1.0 / (H ** 0.5)
    params = dict(
        W1=jax.random.uniform(k1, (H + 1, 2 * H), jnp.float32, -lim1, lim1),
        b1=jnp.ones((2 * H,), jnp.float32),          # graph_conv1 bias init 1.0
        W2=jax.random.uniform(k2, (H + 1, H), jnp.float32, -lim2, lim2),
        b2=jnp.zeros((H,), jnp.float32),             # graph_conv2 bias init 0.0
        Wd=jax.random.uniform(k3, (OUT, H), jnp.float32, -kd, kd),
        bd=jax.random.uniform(k4, (OUT,), jnp.float32, -kd, kd),
    )

    out = jax.block_until_ready(tgcn_regression_forward(x, adj, params))
    ref = jax.block_until_ready(tgcn_regression_reference(x, adj, params))
    np.testing.assert_allclose(np.asarray(out), np.asarray(ref),
                               rtol=1e-3, atol=1e-3)
    print("KERNEL_OK")
</pallas_src>

<mosaic_0001>
module attributes {stable_mosaic.version = 11 : i64} {
  func.func @tgcn_kernel(%arg0: i32, %arg1: memref<1x16x8xf32, #tpu.memory_space<vmem>>, %arg2: memref<16x16xf32, #tpu.memory_space<vmem>>, %arg3: memref<32x16xf32, #tpu.memory_space<vmem>>, %arg4: memref<32x16xf32, #tpu.memory_space<vmem>>, %arg5: memref<1x64xf32, #tpu.memory_space<vmem>>, %arg6: memref<32x64xf32, #tpu.memory_space<vmem>>, %arg7: memref<1x64xf32, #tpu.memory_space<vmem>>, %arg8: memref<1x32xf32, #tpu.memory_space<vmem>>, %arg9: memref<32x32xf32, #tpu.memory_space<vmem>>, %arg10: memref<1x32xf32, #tpu.memory_space<vmem>>, %arg11: memref<32x3xf32, #tpu.memory_space<vmem>>, %arg12: memref<1x3xf32, #tpu.memory_space<vmem>>, %arg13: memref<1x16x3xf32, #tpu.memory_space<vmem>>) attributes {dimension_semantics = [#tpu.dimension_semantics<parallel>], iteration_bounds = array<i64: 2>, scalar_prefetch = 0 : i64, scratch_operands = 0 : i64, tpu.core_type = #tpu.core_type<tc>, window_params = [{transform_indices = @transform_0, window_bounds = array<i64: 1, 16, 8>}, {pipeline_mode = #tpu.pipeline_mode<synchronous>, transform_indices = @transform_1, window_bounds = array<i64: 16, 16>}, {pipeline_mode = #tpu.pipeline_mode<synchronous>, transform_indices = @transform_2, window_bounds = array<i64: 32, 16>}, {pipeline_mode = #tpu.pipeline_mode<synchronous>, transform_indices = @transform_3, window_bounds = array<i64: 32, 16>}, {pipeline_mode = #tpu.pipeline_mode<synchronous>, transform_indices = @transform_4, window_bounds = array<i64: 1, 64>}, {pipeline_mode = #tpu.pipeline_mode<synchronous>, transform_indices = @transform_5, window_bounds = array<i64: 32, 64>}, {pipeline_mode = #tpu.pipeline_mode<synchronous>, transform_indices = @transform_6, window_bounds = array<i64: 1, 64>}, {pipeline_mode = #tpu.pipeline_mode<synchronous>, transform_indices = @transform_7, window_bounds = array<i64: 1, 32>}, {pipeline_mode = #tpu.pipeline_mode<synchronous>, transform_indices = @transform_8, window_bounds = array<i64: 32, 32>}, {pipeline_mode = #tpu.pipeline_mode<synchronous>, transform_indices = @transform_9, window_bounds = array<i64: 1, 32>}, {pipeline_mode = #tpu.pipeline_mode<synchronous>, transform_indices = @transform_10, window_bounds = array<i64: 32, 3>}, {pipeline_mode = #tpu.pipeline_mode<synchronous>, transform_indices = @transform_11, window_bounds = array<i64: 1, 3>}, {transform_indices = @transform_12, window_bounds = array<i64: 1, 16, 3>}]} {
    %c0 = arith.constant 0 : index
    %c0_0 = arith.constant 0 : index
    %0 = vector.load %arg2[%c0, %c0_0] : memref<16x16xf32, #tpu.memory_space<vmem>>, vector<16x16xf32>
    %c0_1 = arith.constant 0 : index
    %c0_2 = arith.constant 0 : index
    %c0_3 = arith.constant 0 : index
    %1 = vector.load %arg1[%c0_1, %c0_2, %c0_3] : memref<1x16x8xf32, #tpu.memory_space<vmem>>, vector<1x16x8xf32>
    %2 = vector.shape_cast %1 : vector<1x16x8xf32> to vector<16x8xf32>
    %c0_4 = arith.constant 0 : index
    %c0_5 = arith.constant 0 : index
    %3 = vector.load %arg3[%c0_4, %c0_5] : memref<32x16xf32, #tpu.memory_space<vmem>>, vector<32x16xf32>
    %c0_6 = arith.constant 0 : index
    %c0_7 = arith.constant 0 : index
    %4 = vector.load %arg4[%c0_6, %c0_7] : memref<32x16xf32, #tpu.memory_space<vmem>>, vector<32x16xf32>
    %c0_8 = arith.constant 0 : index
    %c0_9 = arith.constant 0 : index
    %5 = vector.load %arg6[%c0_8, %c0_9] : memref<32x64xf32, #tpu.memory_space<vmem>>, vector<32x64xf32>
    %c0_10 = arith.constant 0 : index
    %c0_11 = arith.constant 0 : index
    %6 = vector.load %arg9[%c0_10, %c0_11] : memref<32x32xf32, #tpu.memory_space<vmem>>, vector<32x32xf32>
    %cst = arith.constant dense<0.000000e+00> : vector<16x8xf32>
    %7 = tpu.matmul %0, %2, %cst {dimension_numbers = #tpu.dot_dimension_numbers<[1], [0], [0], [1], [0, 0, 1, 1], [], []>} : vector<16x16xf32>, vector<16x8xf32>, vector<16x8xf32> -> vector<16x8xf32>
    %c0_12 = arith.constant 0 : index
    %c0_13 = arith.constant 0 : index
    %8 = vector.load %arg5[%c0_12, %c0_13] : memref<1x64xf32, #tpu.memory_space<vmem>>, vector<1x64xf32>
    %9 = vector.shape_cast %8 : vector<1x64xf32> to vector<1x64xf32>
    %10 = vector.broadcast %9 : vector<1x64xf32> to vector<16x64xf32>
    %c0_14 = arith.constant 0 : index
    %c0_15 = arith.constant 0 : index
    %11 = vector.load %arg7[%c0_14, %c0_15] : memref<1x64xf32, #tpu.memory_space<vmem>>, vector<1x64xf32>
    %12 = vector.shape_cast %11 : vector<1x64xf32> to vector<1x64xf32>
    %13 = vector.broadcast %12 : vector<1x64xf32> to vector<16x64xf32>
    %c0_16 = arith.constant 0 : index
    %c0_17 = arith.constant 0 : index
    %14 = vector.load %arg8[%c0_16, %c0_17] : memref<1x32xf32, #tpu.memory_space<vmem>>, vector<1x32xf32>
    %15 = vector.shape_cast %14 : vector<1x32xf32> to vector<1x32xf32>
    %16 = vector.broadcast %15 : vector<1x32xf32> to vector<16x32xf32>
    %c0_18 = arith.constant 0 : index
    %c0_19 = arith.constant 0 : index
    %17 = vector.load %arg10[%c0_18, %c0_19] : memref<1x32xf32, #tpu.memory_space<vmem>>, vector<1x32xf32>
    %18 = vector.shape_cast %17 : vector<1x32xf32> to vector<1x32xf32>
    %19 = vector.broadcast %18 : vector<1x32xf32> to vector<16x32xf32>
    %cst_20 = arith.constant 0.000000e+00 : f32
    %20 = vector.broadcast %cst_20 : f32 to vector<16x32xf32>
    %21 = vector.extract_strided_slice %7 {offsets = [0, 0], sizes = [16, 1], strides = [1, 1]} : vector<16x8xf32> to vector<16x1xf32>
    %22 = vector.broadcast %21 : vector<16x1xf32> to vector<16x64xf32>
    %23 = arith.mulf %22, %10 : vector<16x64xf32>
    %cst_21 = arith.constant dense<0.000000e+00> : vector<16x32xf32>
    %24 = tpu.matmul %0, %20, %cst_21 {dimension_numbers = #tpu.dot_dimension_numbers<[1], [0], [0], [1], [0, 0, 1, 1], [], []>} : vector<16x16xf32>, vector<16x32xf32>, vector<16x32xf32> -> vector<16x32xf32>
    %cst_22 = arith.constant dense<0.000000e+00> : vector<16x64xf32>
    %25 = tpu.matmul %24, %5, %cst_22 {dimension_numbers = #tpu.dot_dimension_numbers<[1], [0], [0], [1], [0, 0, 1, 1], [], []>} : vector<16x32xf32>, vector<32x64xf32>, vector<16x64xf32> -> vector<16x64xf32>
    %26 = arith.addf %23, %25 : vector<16x64xf32>
    %27 = arith.addf %26, %13 : vector<16x64xf32>
    %28 = arith.negf %27 : vector<16x64xf32>
    %29 = math.exp %28 : vector<16x64xf32>
    %cst_23 = arith.constant 1.000000e+00 : f32
    %30 = vector.broadcast %cst_23 : f32 to vector<16x64xf32>
    %31 = arith.addf %30, %29 : vector<16x64xf32>
    %32 = arith.divf %30, %31 : vector<16x64xf32>
    %cst_24 = arith.constant dense<0.000000e+00> : vector<32x64xf32>
    %33 = tpu.matmul %3, %32, %cst_24 {dimension_numbers = #tpu.dot_dimension_numbers<[1], [0], [0], [1], [0, 0, 1, 1], [], []>} : vector<32x16xf32>, vector<16x64xf32>, vector<32x64xf32> -> vector<32x64xf32>
    %34 = vector.extract_strided_slice %33 {offsets = [0, 0], sizes = [32, 32], strides = [1, 1]} : vector<32x64xf32> to vector<32x32xf32>
    %cst_25 = arith.constant dense<0.000000e+00> : vector<32x64xf32>
    %35 = tpu.matmul %4, %32, %cst_25 {dimension_numbers = #tpu.dot_dimension_numbers<[1], [0], [0], [1], [0, 0, 1, 1], [], []>} : vector<32x16xf32>, vector<16x64xf32>, vector<32x64xf32> -> vector<32x64xf32>
    %36 = vector.extract_strided_slice %35 {offsets = [0, 32], sizes = [32, 32], strides = [1, 1]} : vector<32x64xf32> to vector<32x32xf32>
    %37 = arith.addf %34, %36 : vector<32x32xf32>
    %38 = vector.extract_strided_slice %37 {offsets = [0, 0], sizes = [16, 32], strides = [1, 1]} : vector<32x32xf32> to vector<16x32xf32>
    %39 = vector.extract_strided_slice %37 {offsets = [16, 0], sizes = [16, 32], strides = [1, 1]} : vector<32x32xf32> to vector<16x32xf32>
    %40 = vector.broadcast %21 : vector<16x1xf32> to vector<16x32xf32>
    %41 = arith.mulf %40, %16 : vector<16x32xf32>
    %42 = arith.mulf %38, %20 : vector<16x32xf32>
    %cst_26 = arith.constant dense<0.000000e+00> : vector<16x32xf32>
    %43 = tpu.matmul %0, %42, %cst_26 {dimension_numbers = #tpu.dot_dimension_numbers<[1], [0], [0], [1], [0, 0, 1, 1], [], []>} : vector<16x16xf32>, vector<16x32xf32>, vector<16x32xf32> -> vector<16x32xf32>
    %cst_27 = arith.constant dense<0.000000e+00> : vector<16x32xf32>
    %44 = tpu.matmul %43, %6, %cst_27 {dimension_numbers = #tpu.dot_dimension_numbers<[1], [0], [0], [1], [0, 0, 1, 1], [], []>} : vector<16x32xf32>, vector<32x32xf32>, vector<16x32xf32> -> vector<16x32xf32>
    %45 = arith.addf %41, %44 : vector<16x32xf32>
    %46 = arith.addf %45, %19 : vector<16x32xf32>
    %47 = math.tanh %46 : vector<16x32xf32>
    %48 = arith.mulf %39, %20 : vector<16x32xf32>
    %cst_28 = arith.constant 1.000000e+00 : f32
    %49 = vector.broadcast %cst_28 : f32 to vector<16x32xf32>
    %50 = arith.subf %49, %39 : vector<16x32xf32>
    %51 = arith.mulf %50, %47 : vector<16x32xf32>
    %52 = arith.addf %48, %51 : vector<16x32xf32>
    %53 = vector.extract_strided_slice %7 {offsets = [0, 1], sizes = [16, 1], strides = [1, 1]} : vector<16x8xf32> to vector<16x1xf32>
    %54 = vector.broadcast %53 : vector<16x1xf32> to vector<16x64xf32>
    %55 = arith.mulf %54, %10 : vector<16x64xf32>
    %cst_29 = arith.constant dense<0.000000e+00> : vector<16x32xf32>
    %56 = tpu.matmul %0, %52, %cst_29 {dimension_numbers = #tpu.dot_dimension_numbers<[1], [0], [0], [1], [0, 0, 1, 1], [], []>} : vector<16x16xf32>, vector<16x32xf32>, vector<16x32xf32> -> vector<16x32xf32>
    %cst_30 = arith.constant dense<0.000000e+00> : vector<16x64xf32>
    %57 = tpu.matmul %56, %5, %cst_30 {dimension_numbers = #tpu.dot_dimension_numbers<[1], [0], [0], [1], [0, 0, 1, 1], [], []>} : vector<16x32xf32>, vector<32x64xf32>, vector<16x64xf32> -> vector<16x64xf32>
    %58 = arith.addf %55, %57 : vector<16x64xf32>
    %59 = arith.addf %58, %13 : vector<16x64xf32>
    %60 = arith.negf %59 : vector<16x64xf32>
    %61 = math.exp %60 : vector<16x64xf32>
    %cst_31 = arith.constant 1.000000e+00 : f32
    %62 = vector.broadcast %cst_31 : f32 to vector<16x64xf32>
    %63 = arith.addf %62, %61 : vector<16x64xf32>
    %64 = arith.divf %62, %63 : vector<16x64xf32>
    %cst_32 = arith.constant dense<0.000000e+00> : vector<32x64xf32>
    %65 = tpu.matmul %3, %64, %cst_32 {dimension_numbers = #tpu.dot_dimension_numbers<[1], [0], [0], [1], [0, 0, 1, 1], [], []>} : vector<32x16xf32>, vector<16x64xf32>, vector<32x64xf32> -> vector<32x64xf32>
    %66 = vector.extract_strided_slice %65 {offsets = [0, 0], sizes = [32, 32], strides = [1, 1]} : vector<32x64xf32> to vector<32x32xf32>
    %cst_33 = arith.constant dense<0.000000e+00> : vector<32x64xf32>
    %67 = tpu.matmul %4, %64, %cst_33 {dimension_numbers = #tpu.dot_dimension_numbers<[1], [0], [0], [1], [0, 0, 1, 1], [], []>} : vector<32x16xf32>, vector<16x64xf32>, vector<32x64xf32> -> vector<32x64xf32>
    %68 = vector.extract_strided_slice %67 {offsets = [0, 32], sizes = [32, 32], strides = [1, 1]} : vector<32x64xf32> to vector<32x32xf32>
    %69 = arith.addf %66, %68 : vector<32x32xf32>
    %70 = vector.extract_strided_slice %69 {offsets = [0, 0], sizes = [16, 32], strides = [1, 1]} : vector<32x32xf32> to vector<16x32xf32>
    %71 = vector.extract_strided_slice %69 {offsets = [16, 0], sizes = [16, 32], strides = [1, 1]} : vector<32x32xf32> to vector<16x32xf32>
    %72 = vector.broadcast %53 : vector<16x1xf32> to vector<16x32xf32>
    %73 = arith.mulf %72, %16 : vector<16x32xf32>
    %74 = arith.mulf %70, %52 : vector<16x32xf32>
    %cst_34 = arith.constant dense<0.000000e+00> : vector<16x32xf32>
    %75 = tpu.matmul %0, %74, %cst_34 {dimension_numbers = #tpu.dot_dimension_numbers<[1], [0], [0], [1], [0, 0, 1, 1], [], []>} : vector<16x16xf32>, vector<16x32xf32>, vector<16x32xf32> -> vector<16x32xf32>
    %cst_35 = arith.constant dense<0.000000e+00> : vector<16x32xf32>
    %76 = tpu.matmul %75, %6, %cst_35 {dimension_numbers = #tpu.dot_dimension_numbers<[1], [0], [0], [1], [0, 0, 1, 1], [], []>} : vector<16x32xf32>, vector<32x32xf32>, vector<16x32xf32> -> vector<16x32xf32>
    %77 = arith.addf %73, %76 : vector<16x32xf32>
    %78 = arith.addf %77, %19 : vector<16x32xf32>
    %79 = math.tanh %78 : vector<16x32xf32>
    %80 = arith.mulf %71, %52 : vector<16x32xf32>
    %cst_36 = arith.constant 1.000000e+00 : f32
    %81 = vector.broadcast %cst_36 : f32 to vector<16x32xf32>
    %82 = arith.subf %81, %71 : vector<16x32xf32>
    %83 = arith.mulf %82, %79 : vector<16x32xf32>
    %84 = arith.addf %80, %83 : vector<16x32xf32>
    %85 = vector.extract_strided_slice %7 {offsets = [0, 2], sizes = [16, 1], strides = [1, 1]} : vector<16x8xf32> to vector<16x1xf32>
    %86 = vector.broadcast %85 : vector<16x1xf32> to vector<16x64xf32>
    %87 = arith.mulf %86, %10 : vector<16x64xf32>
    %cst_37 = arith.constant dense<0.000000e+00> : vector<16x32xf32>
    %88 = tpu.matmul %0, %84, %cst_37 {dimension_numbers = #tpu.dot_dimension_numbers<[1], [0], [0], [1], [0, 0, 1, 1], [], []>} : vector<16x16xf32>, vector<16x32xf32>, vector<16x32xf32> -> vector<16x32xf32>
    %cst_38 = arith.constant dense<0.000000e+00> : vector<16x64xf32>
    %89 = tpu.matmul %88, %5, %cst_38 {dimension_numbers = #tpu.dot_dimension_numbers<[1], [0], [0], [1], [0, 0, 1, 1], [], []>} : vector<16x32xf32>, vector<32x64xf32>, vector<16x64xf32> -> vector<16x64xf32>
    %90 = arith.addf %87, %89 : vector<16x64xf32>
    %91 = arith.addf %90, %13 : vector<16x64xf32>
    %92 = arith.negf %91 : vector<16x64xf32>
    %93 = math.exp %92 : vector<16x64xf32>
    %cst_39 = arith.constant 1.000000e+00 : f32
    %94 = vector.broadcast %cst_39 : f32 to vector<16x64xf32>
    %95 = arith.addf %94, %93 : vector<16x64xf32>
    %96 = arith.divf %94, %95 : vector<16x64xf32>
    %cst_40 = arith.constant dense<0.000000e+00> : vector<32x64xf32>
    %97 = tpu.matmul %3, %96, %cst_40 {dimension_numbers = #tpu.dot_dimension_numbers<[1], [0], [0], [1], [0, 0, 1, 1], [], []>} : vector<32x16xf32>, vector<16x64xf32>, vector<32x64xf32> -> vector<32x64xf32>
    %98 = vector.extract_strided_slice %97 {offsets = [0, 0], sizes = [32, 32], strides = [1, 1]} : vector<32x64xf32> to vector<32x32xf32>
    %cst_41 = arith.constant dense<0.000000e+00> : vector<32x64xf32>
    %99 = tpu.matmul %4, %96, %cst_41 {dimension_numbers = #tpu.dot_dimension_numbers<[1], [0], [0], [1], [0, 0, 1, 1], [], []>} : vector<32x16xf32>, vector<16x64xf32>, vector<32x64xf32> -> vector<32x64xf32>
    %100 = vector.extract_strided_slice %99 {offsets = [0, 32], sizes = [32, 32], strides = [1, 1]} : vector<32x64xf32> to vector<32x32xf32>
    %101 = arith.addf %98, %100 : vector<32x32xf32>
    %102 = vector.extract_strided_slice %101 {offsets = [0, 0], sizes = [16, 32], strides = [1, 1]} : vector<32x32xf32> to vector<16x32xf32>
    %103 = vector.extract_strided_slice %101 {offsets = [16, 0], sizes = [16, 32], strides = [1, 1]} : vector<32x32xf32> to vector<16x32xf32>
    %104 = vector.broadcast %85 : vector<16x1xf32> to vector<16x32xf32>
    %105 = arith.mulf %104, %16 : vector<16x32xf32>
    %106 = arith.mulf %102, %84 : vector<16x32xf32>
    %cst_42 = arith.constant dense<0.000000e+00> : vector<16x32xf32>
    %107 = tpu.matmul %0, %106, %cst_42 {dimension_numbers = #tpu.dot_dimension_numbers<[1], [0], [0], [1], [0, 0, 1, 1], [], []>} : vector<16x16xf32>, vector<16x32xf32>, vector<16x32xf32> -> vector<16x32xf32>
    %cst_43 = arith.constant dense<0.000000e+00> : vector<16x32xf32>
    %108 = tpu.matmul %107, %6, %cst_43 {dimension_numbers = #tpu.dot_dimension_numbers<[1], [0], [0], [1], [0, 0, 1, 1], [], []>} : vector<16x32xf32>, vector<32x32xf32>, vector<16x32xf32> -> vector<16x32xf32>
    %109 = arith.addf %105, %108 : vector<16x32xf32>
    %110 = arith.addf %109, %19 : vector<16x32xf32>
    %111 = math.tanh %110 : vector<16x32xf32>
    %112 = arith.mulf %103, %84 : vector<16x32xf32>
    %cst_44 = arith.constant 1.000000e+00 : f32
    %113 = vector.broadcast %cst_44 : f32 to vector<16x32xf32>
    %114 = arith.subf %113, %103 : vector<16x32xf32>
    %115 = arith.mulf %114, %111 : vector<16x32xf32>
    %116 = arith.addf %112, %115 : vector<16x32xf32>
    %117 = vector.extract_strided_slice %7 {offsets = [0, 3], sizes = [16, 1], strides = [1, 1]} : vector<16x8xf32> to vector<16x1xf32>
    %118 = vector.broadcast %117 : vector<16x1xf32> to vector<16x64xf32>
    %119 = arith.mulf %118, %10 : vector<16x64xf32>
    %cst_45 = arith.constant dense<0.000000e+00> : vector<16x32xf32>
    %120 = tpu.matmul %0, %116, %cst_45 {dimension_numbers = #tpu.dot_dimension_numbers<[1], [0], [0], [1], [0, 0, 1, 1], [], []>} : vector<16x16xf32>, vector<16x32xf32>, vector<16x32xf32> -> vector<16x32xf32>
    %cst_46 = arith.constant dense<0.000000e+00> : vector<16x64xf32>
    %121 = tpu.matmul %120, %5, %cst_46 {dimension_numbers = #tpu.dot_dimension_numbers<[1], [0], [0], [1], [0, 0, 1, 1], [], []>} : vector<16x32xf32>, vector<32x64xf32>, vector<16x64xf32> -> vector<16x64xf32>
    %122 = arith.addf %119, %121 : vector<16x64xf32>
    %123 = arith.addf %122, %13 : vector<16x64xf32>
    %124 = arith.negf %123 : vector<16x64xf32>
    %125 = math.exp %124 : vector<16x64xf32>
    %cst_47 = arith.constant 1.000000e+00 : f32
    %126 = vector.broadcast %cst_47 : f32 to vector<16x64xf32>
    %127 = arith.addf %126, %125 : vector<16x64xf32>
    %128 = arith.divf %126, %127 : vector<16x64xf32>
    %cst_48 = arith.constant dense<0.000000e+00> : vector<32x64xf32>
    %129 = tpu.matmul %3, %128, %cst_48 {dimension_numbers = #tpu.dot_dimension_numbers<[1], [0], [0], [1], [0, 0, 1, 1], [], []>} : vector<32x16xf32>, vector<16x64xf32>, vector<32x64xf32> -> vector<32x64xf32>
    %130 = vector.extract_strided_slice %129 {offsets = [0, 0], sizes = [32, 32], strides = [1, 1]} : vector<32x64xf32> to vector<32x32xf32>
    %cst_49 = arith.constant dense<0.000000e+00> : vector<32x64xf32>
    %131 = tpu.matmul %4, %128, %cst_49 {dimension_numbers = #tpu.dot_dimension_numbers<[1], [0], [0], [1], [0, 0, 1, 1], [], []>} : vector<32x16xf32>, vector<16x64xf32>, vector<32x64xf32> -> vector<32x64xf32>
    %132 = vector.extract_strided_slice %131 {offsets = [0, 32], sizes = [32, 32], strides = [1, 1]} : vector<32x64xf32> to vector<32x32xf32>
    %133 = arith.addf %130, %132 : vector<32x32xf32>
    %134 = vector.extract_strided_slice %133 {offsets = [0, 0], sizes = [16, 32], strides = [1, 1]} : vector<32x32xf32> to vector<16x32xf32>
    %135 = vector.extract_strided_slice %133 {offsets = [16, 0], sizes = [16, 32], strides = [1, 1]} : vector<32x32xf32> to vector<16x32xf32>
    %136 = vector.broadcast %117 : vector<16x1xf32> to vector<16x32xf32>
    %137 = arith.mulf %136, %16 : vector<16x32xf32>
    %138 = arith.mulf %134, %116 : vector<16x32xf32>
    %cst_50 = arith.constant dense<0.000000e+00> : vector<16x32xf32>
    %139 = tpu.matmul %0, %138, %cst_50 {dimension_numbers = #tpu.dot_dimension_numbers<[1], [0], [0], [1], [0, 0, 1, 1], [], []>} : vector<16x16xf32>, vector<16x32xf32>, vector<16x32xf32> -> vector<16x32xf32>
    %cst_51 = arith.constant dense<0.000000e+00> : vector<16x32xf32>
    %140 = tpu.matmul %139, %6, %cst_51 {dimension_numbers = #tpu.dot_dimension_numbers<[1], [0], [0], [1], [0, 0, 1, 1], [], []>} : vector<16x32xf32>, vector<32x32xf32>, vector<16x32xf32> -> vector<16x32xf32>
    %141 = arith.addf %137, %140 : vector<16x32xf32>
    %142 = arith.addf %141, %19 : vector<16x32xf32>
    %143 = math.tanh %142 : vector<16x32xf32>
    %144 = arith.mulf %135, %116 : vector<16x32xf32>
    %cst_52 = arith.constant 1.000000e+00 : f32
    %145 = vector.broadcast %cst_52 : f32 to vector<16x32xf32>
    %146 = arith.subf %145, %135 : vector<16x32xf32>
    %147 = arith.mulf %146, %143 : vector<16x32xf32>
    %148 = arith.addf %144, %147 : vector<16x32xf32>
    %149 = vector.extract_strided_slice %7 {offsets = [0, 4], sizes = [16, 1], strides = [1, 1]} : vector<16x8xf32> to vector<16x1xf32>
    %150 = vector.broadcast %149 : vector<16x1xf32> to vector<16x64xf32>
    %151 = arith.mulf %150, %10 : vector<16x64xf32>
    %cst_53 = arith.constant dense<0.000000e+00> : vector<16x32xf32>
    %152 = tpu.matmul %0, %148, %cst_53 {dimension_numbers = #tpu.dot_dimension_numbers<[1], [0], [0], [1], [0, 0, 1, 1], [], []>} : vector<16x16xf32>, vector<16x32xf32>, vector<16x32xf32> -> vector<16x32xf32>
    %cst_54 = arith.constant dense<0.000000e+00> : vector<16x64xf32>
    %153 = tpu.matmul %152, %5, %cst_54 {dimension_numbers = #tpu.dot_dimension_numbers<[1], [0], [0], [1], [0, 0, 1, 1], [], []>} : vector<16x32xf32>, vector<32x64xf32>, vector<16x64xf32> -> vector<16x64xf32>
    %154 = arith.addf %151, %153 : vector<16x64xf32>
    %155 = arith.addf %154, %13 : vector<16x64xf32>
    %156 = arith.negf %155 : vector<16x64xf32>
    %157 = math.exp %156 : vector<16x64xf32>
    %cst_55 = arith.constant 1.000000e+00 : f32
    %158 = vector.broadcast %cst_55 : f32 to vector<16x64xf32>
    %159 = arith.addf %158, %157 : vector<16x64xf32>
    %160 = arith.divf %158, %159 : vector<16x64xf32>
    %cst_56 = arith.constant dense<0.000000e+00> : vector<32x64xf32>
    %161 = tpu.matmul %3, %160, %cst_56 {dimension_numbers = #tpu.dot_dimension_numbers<[1], [0], [0], [1], [0, 0, 1, 1], [], []>} : vector<32x16xf32>, vector<16x64xf32>, vector<32x64xf32> -> vector<32x64xf32>
    %162 = vector.extract_strided_slice %161 {offsets = [0, 0], sizes = [32, 32], strides = [1, 1]} : vector<32x64xf32> to vector<32x32xf32>
    %cst_57 = arith.constant dense<0.000000e+00> : vector<32x64xf32>
    %163 = tpu.matmul %4, %160, %cst_57 {dimension_numbers = #tpu.dot_dimension_numbers<[1], [0], [0], [1], [0, 0, 1, 1], [], []>} : vector<32x16xf32>, vector<16x64xf32>, vector<32x64xf32> -> vector<32x64xf32>
    %164 = vector.extract_strided_slice %163 {offsets = [0, 32], sizes = [32, 32], strides = [1, 1]} : vector<32x64xf32> to vector<32x32xf32>
    %165 = arith.addf %162, %164 : vector<32x32xf32>
    %166 = vector.extract_strided_slice %165 {offsets = [0, 0], sizes = [16, 32], strides = [1, 1]} : vector<32x32xf32> to vector<16x32xf32>
    %167 = vector.extract_strided_slice %165 {offsets = [16, 0], sizes = [16, 32], strides = [1, 1]} : vector<32x32xf32> to vector<16x32xf32>
    %168 = vector.broadcast %149 : vector<16x1xf32> to vector<16x32xf32>
    %169 = arith.mulf %168, %16 : vector<16x32xf32>
    %170 = arith.mulf %166, %148 : vector<16x32xf32>
    %cst_58 = arith.constant dense<0.000000e+00> : vector<16x32xf32>
    %171 = tpu.matmul %0, %170, %cst_58 {dimension_numbers = #tpu.dot_dimension_numbers<[1], [0], [0], [1], [0, 0, 1, 1], [], []>} : vector<16x16xf32>, vector<16x32xf32>, vector<16x32xf32> -> vector<16x32xf32>
    %cst_59 = arith.constant dense<0.000000e+00> : vector<16x32xf32>
    %172 = tpu.matmul %171, %6, %cst_59 {dimension_numbers = #tpu.dot_dimension_numbers<[1], [0], [0], [1], [0, 0, 1, 1], [], []>} : vector<16x32xf32>, vector<32x32xf32>, vector<16x32xf32> -> vector<16x32xf32>
    %173 = arith.addf %169, %172 : vector<16x32xf32>
    %174 = arith.addf %173, %19 : vector<16x32xf32>
    %175 = math.tanh %174 : vector<16x32xf32>
    %176 = arith.mulf %167, %148 : vector<16x32xf32>
    %cst_60 = arith.constant 1.000000e+00 : f32
    %177 = vector.broadcast %cst_60 : f32 to vector<16x32xf32>
    %178 = arith.subf %177, %167 : vector<16x32xf32>
    %179 = arith.mulf %178, %175 : vector<16x32xf32>
    %180 = arith.addf %176, %179 : vector<16x32xf32>
    %181 = vector.extract_strided_slice %7 {offsets = [0, 5], sizes = [16, 1], strides = [1, 1]} : vector<16x8xf32> to vector<16x1xf32>
    %182 = vector.broadcast %181 : vector<16x1xf32> to vector<16x64xf32>
    %183 = arith.mulf %182, %10 : vector<16x64xf32>
    %cst_61 = arith.constant dense<0.000000e+00> : vector<16x32xf32>
    %184 = tpu.matmul %0, %180, %cst_61 {dimension_numbers = #tpu.dot_dimension_numbers<[1], [0], [0], [1], [0, 0, 1, 1], [], []>} : vector<16x16xf32>, vector<16x32xf32>, vector<16x32xf32> -> vector<16x32xf32>
    %cst_62 = arith.constant dense<0.000000e+00> : vector<16x64xf32>
    %185 = tpu.matmul %184, %5, %cst_62 {dimension_numbers = #tpu.dot_dimension_numbers<[1], [0], [0], [1], [0, 0, 1, 1], [], []>} : vector<16x32xf32>, vector<32x64xf32>, vector<16x64xf32> -> vector<16x64xf32>
    %186 = arith.addf %183, %185 : vector<16x64xf32>
    %187 = arith.addf %186, %13 : vector<16x64xf32>
    %188 = arith.negf %187 : vector<16x64xf32>
    %189 = math.exp %188 : vector<16x64xf32>
    %cst_63 = arith.constant 1.000000e+00 : f32
    %190 = vector.broadcast %cst_63 : f32 to vector<16x64xf32>
    %191 = arith.addf %190, %189 : vector<16x64xf32>
    %192 = arith.divf %190, %191 : vector<16x64xf32>
    %cst_64 = arith.constant dense<0.000000e+00> : vector<32x64xf32>
    %193 = tpu.matmul %3, %192, %cst_64 {dimension_numbers = #tpu.dot_dimension_numbers<[1], [0], [0], [1], [0, 0, 1, 1], [], []>} : vector<32x16xf32>, vector<16x64xf32>, vector<32x64xf32> -> vector<32x64xf32>
    %194 = vector.extract_strided_slice %193 {offsets = [0, 0], sizes = [32, 32], strides = [1, 1]} : vector<32x64xf32> to vector<32x32xf32>
    %cst_65 = arith.constant dense<0.000000e+00> : vector<32x64xf32>
    %195 = tpu.matmul %4, %192, %cst_65 {dimension_numbers = #tpu.dot_dimension_numbers<[1], [0], [0], [1], [0, 0, 1, 1], [], []>} : vector<32x16xf32>, vector<16x64xf32>, vector<32x64xf32> -> vector<32x64xf32>
    %196 = vector.extract_strided_slice %195 {offsets = [0, 32], sizes = [32, 32], strides = [1, 1]} : vector<32x64xf32> to vector<32x32xf32>
    %197 = arith.addf %194, %196 : vector<32x32xf32>
    %198 = vector.extract_strided_slice %197 {offsets = [0, 0], sizes = [16, 32], strides = [1, 1]} : vector<32x32xf32> to vector<16x32xf32>
    %199 = vector.extract_strided_slice %197 {offsets = [16, 0], sizes = [16, 32], strides = [1, 1]} : vector<32x32xf32> to vector<16x32xf32>
    %200 = vector.broadcast %181 : vector<16x1xf32> to vector<16x32xf32>
    %201 = arith.mulf %200, %16 : vector<16x32xf32>
    %202 = arith.mulf %198, %180 : vector<16x32xf32>
    %cst_66 = arith.constant dense<0.000000e+00> : vector<16x32xf32>
    %203 = tpu.matmul %0, %202, %cst_66 {dimension_numbers = #tpu.dot_dimension_numbers<[1], [0], [0], [1], [0, 0, 1, 1], [], []>} : vector<16x16xf32>, vector<16x32xf32>, vector<16x32xf32> -> vector<16x32xf32>
    %cst_67 = arith.constant dense<0.000000e+00> : vector<16x32xf32>
    %204 = tpu.matmul %203, %6, %cst_67 {dimension_numbers = #tpu.dot_dimension_numbers<[1], [0], [0], [1], [0, 0, 1, 1], [], []>} : vector<16x32xf32>, vector<32x32xf32>, vector<16x32xf32> -> vector<16x32xf32>
    %205 = arith.addf %201, %204 : vector<16x32xf32>
    %206 = arith.addf %205, %19 : vector<16x32xf32>
    %207 = math.tanh %206 : vector<16x32xf32>
    %208 = arith.mulf %199, %180 : vector<16x32xf32>
    %cst_68 = arith.constant 1.000000e+00 : f32
    %209 = vector.broadcast %cst_68 : f32 to vector<16x32xf32>
    %210 = arith.subf %209, %199 : vector<16x32xf32>
    %211 = arith.mulf %210, %207 : vector<16x32xf32>
    %212 = arith.addf %208, %211 : vector<16x32xf32>
    %213 = vector.extract_strided_slice %7 {offsets = [0, 6], sizes = [16, 1], strides = [1, 1]} : vector<16x8xf32> to vector<16x1xf32>
    %214 = vector.broadcast %213 : vector<16x1xf32> to vector<16x64xf32>
    %215 = arith.mulf %214, %10 : vector<16x64xf32>
    %cst_69 = arith.constant dense<0.000000e+00> : vector<16x32xf32>
    %216 = tpu.matmul %0, %212, %cst_69 {dimension_numbers = #tpu.dot_dimension_numbers<[1], [0], [0], [1], [0, 0, 1, 1], [], []>} : vector<16x16xf32>, vector<16x32xf32>, vector<16x32xf32> -> vector<16x32xf32>
    %cst_70 = arith.constant dense<0.000000e+00> : vector<16x64xf32>
    %217 = tpu.matmul %216, %5, %cst_70 {dimension_numbers = #tpu.dot_dimension_numbers<[1], [0], [0], [1], [0, 0, 1, 1], [], []>} : vector<16x32xf32>, vector<32x64xf32>, vector<16x64xf32> -> vector<16x64xf32>
    %218 = arith.addf %215, %217 : vector<16x64xf32>
    %219 = arith.addf %218, %13 : vector<16x64xf32>
    %220 = arith.negf %219 : vector<16x64xf32>
    %221 = math.exp %220 : vector<16x64xf32>
    %cst_71 = arith.constant 1.000000e+00 : f32
    %222 = vector.broadcast %cst_71 : f32 to vector<16x64xf32>
    %223 = arith.addf %222, %221 : vector<16x64xf32>
    %224 = arith.divf %222, %223 : vector<16x64xf32>
    %cst_72 = arith.constant dense<0.000000e+00> : vector<32x64xf32>
    %225 = tpu.matmul %3, %224, %cst_72 {dimension_numbers = #tpu.dot_dimension_numbers<[1], [0], [0], [1], [0, 0, 1, 1], [], []>} : vector<32x16xf32>, vector<16x64xf32>, vector<32x64xf32> -> vector<32x64xf32>
    %226 = vector.extract_strided_slice %225 {offsets = [0, 0], sizes = [32, 32], strides = [1, 1]} : vector<32x64xf32> to vector<32x32xf32>
    %cst_73 = arith.constant dense<0.000000e+00> : vector<32x64xf32>
    %227 = tpu.matmul %4, %224, %cst_73 {dimension_numbers = #tpu.dot_dimension_numbers<[1], [0], [0], [1], [0, 0, 1, 1], [], []>} : vector<32x16xf32>, vector<16x64xf32>, vector<32x64xf32> -> vector<32x64xf32>
    %228 = vector.extract_strided_slice %227 {offsets = [0, 32], sizes = [32, 32], strides = [1, 1]} : vector<32x64xf32> to vector<32x32xf32>
    %229 = arith.addf %226, %228 : vector<32x32xf32>
    %230 = vector.extract_strided_slice %229 {offsets = [0, 0], sizes = [16, 32], strides = [1, 1]} : vector<32x32xf32> to vector<16x32xf32>
    %231 = vector.extract_strided_slice %229 {offsets = [16, 0], sizes = [16, 32], strides = [1, 1]} : vector<32x32xf32> to vector<16x32xf32>
    %232 = vector.broadcast %213 : vector<16x1xf32> to vector<16x32xf32>
    %233 = arith.mulf %232, %16 : vector<16x32xf32>
    %234 = arith.mulf %230, %212 : vector<16x32xf32>
    %cst_74 = arith.constant dense<0.000000e+00> : vector<16x32xf32>
    %235 = tpu.matmul %0, %234, %cst_74 {dimension_numbers = #tpu.dot_dimension_numbers<[1], [0], [0], [1], [0, 0, 1, 1], [], []>} : vector<16x16xf32>, vector<16x32xf32>, vector<16x32xf32> -> vector<16x32xf32>
    %cst_75 = arith.constant dense<0.000000e+00> : vector<16x32xf32>
    %236 = tpu.matmul %235, %6, %cst_75 {dimension_numbers = #tpu.dot_dimension_numbers<[1], [0], [0], [1], [0, 0, 1, 1], [], []>} : vector<16x32xf32>, vector<32x32xf32>, vector<16x32xf32> -> vector<16x32xf32>
    %237 = arith.addf %233, %236 : vector<16x32xf32>
    %238 = arith.addf %237, %19 : vector<16x32xf32>
    %239 = math.tanh %238 : vector<16x32xf32>
    %240 = arith.mulf %231, %212 : vector<16x32xf32>
    %cst_76 = arith.constant 1.000000e+00 : f32
    %241 = vector.broadcast %cst_76 : f32 to vector<16x32xf32>
    %242 = arith.subf %241, %231 : vector<16x32xf32>
    %243 = arith.mulf %242, %239 : vector<16x32xf32>
    %244 = arith.addf %240, %243 : vector<16x32xf32>
    %245 = vector.extract_strided_slice %7 {offsets = [0, 7], sizes = [16, 1], strides = [1, 1]} : vector<16x8xf32> to vector<16x1xf32>
    %246 = vector.broadcast %245 : vector<16x1xf32> to vector<16x64xf32>
    %247 = arith.mulf %246, %10 : vector<16x64xf32>
    %cst_77 = arith.constant dense<0.000000e+00> : vector<16x32xf32>
    %248 = tpu.matmul %0, %244, %cst_77 {dimension_numbers = #tpu.dot_dimension_numbers<[1], [0], [0], [1], [0, 0, 1, 1], [], []>} : vector<16x16xf32>, vector<16x32xf32>, vector<16x32xf32> -> vector<16x32xf32>
    %cst_78 = arith.constant dense<0.000000e+00> : vector<16x64xf32>
    %249 = tpu.matmul %248, %5, %cst_78 {dimension_numbers = #tpu.dot_dimension_numbers<[1], [0], [0], [1], [0, 0, 1, 1], [], []>} : vector<16x32xf32>, vector<32x64xf32>, vector<16x64xf32> -> vector<16x64xf32>
    %250 = arith.addf %247, %249 : vector<16x64xf32>
    %251 = arith.addf %250, %13 : vector<16x64xf32>
    %252 = arith.negf %251 : vector<16x64xf32>
    %253 = math.exp %252 : vector<16x64xf32>
    %cst_79 = arith.constant 1.000000e+00 : f32
    %254 = vector.broadcast %cst_79 : f32 to vector<16x64xf32>
    %255 = arith.addf %254, %253 : vector<16x64xf32>
    %256 = arith.divf %254, %255 : vector<16x64xf32>
    %cst_80 = arith.constant dense<0.000000e+00> : vector<32x64xf32>
    %257 = tpu.matmul %3, %256, %cst_80 {dimension_numbers = #tpu.dot_dimension_numbers<[1], [0], [0], [1], [0, 0, 1, 1], [], []>} : vector<32x16xf32>, vector<16x64xf32>, vector<32x64xf32> -> vector<32x64xf32>
    %258 = vector.extract_strided_slice %257 {offsets = [0, 0], sizes = [32, 32], strides = [1, 1]} : vector<32x64xf32> to vector<32x32xf32>
    %cst_81 = arith.constant dense<0.000000e+00> : vector<32x64xf32>
    %259 = tpu.matmul %4, %256, %cst_81 {dimension_numbers = #tpu.dot_dimension_numbers<[1], [0], [0], [1], [0, 0, 1, 1], [], []>} : vector<32x16xf32>, vector<16x64xf32>, vector<32x64xf32> -> vector<32x64xf32>
    %260 = vector.extract_strided_slice %259 {offsets = [0, 32], sizes = [32, 32], strides = [1, 1]} : vector<32x64xf32> to vector<32x32xf32>
    %261 = arith.addf %258, %260 : vector<32x32xf32>
    %262 = vector.extract_strided_slice %261 {offsets = [0, 0], sizes = [16, 32], strides = [1, 1]} : vector<32x32xf32> to vector<16x32xf32>
    %263 = vector.extract_strided_slice %261 {offsets = [16, 0], sizes = [16, 32], strides = [1, 1]} : vector<32x32xf32> to vector<16x32xf32>
    %264 = vector.broadcast %245 : vector<16x1xf32> to vector<16x32xf32>
    %265 = arith.mulf %264, %16 : vector<16x32xf32>
    %266 = arith.mulf %262, %244 : vector<16x32xf32>
    %cst_82 = arith.constant dense<0.000000e+00> : vector<16x32xf32>
    %267 = tpu.matmul %0, %266, %cst_82 {dimension_numbers = #tpu.dot_dimension_numbers<[1], [0], [0], [1], [0, 0, 1, 1], [], []>} : vector<16x16xf32>, vector<16x32xf32>, vector<16x32xf32> -> vector<16x32xf32>
    %cst_83 = arith.constant dense<0.000000e+00> : vector<16x32xf32>
    %268 = tpu.matmul %267, %6, %cst_83 {dimension_numbers = #tpu.dot_dimension_numbers<[1], [0], [0], [1], [0, 0, 1, 1], [], []>} : vector<16x32xf32>, vector<32x32xf32>, vector<16x32xf32> -> vector<16x32xf32>
    %269 = arith.addf %265, %268 : vector<16x32xf32>
    %270 = arith.addf %269, %19 : vector<16x32xf32>
    %271 = math.tanh %270 : vector<16x32xf32>
    %272 = arith.mulf %263, %244 : vector<16x32xf32>
    %cst_84 = arith.constant 1.000000e+00 : f32
    %273 = vector.broadcast %cst_84 : f32 to vector<16x32xf32>
    %274 = arith.subf %273, %263 : vector<16x32xf32>
    %275 = arith.mulf %274, %271 : vector<16x32xf32>
    %276 = arith.addf %272, %275 : vector<16x32xf32>
    %c0_85 = arith.constant 0 : index
    %c0_86 = arith.constant 0 : index
    %277 = vector.load %arg11[%c0_85, %c0_86] : memref<32x3xf32, #tpu.memory_space<vmem>>, vector<32x3xf32>
    %cst_87 = arith.constant dense<0.000000e+00> : vector<16x3xf32>
    %278 = tpu.matmul %276, %277, %cst_87 {dimension_numbers = #tpu.dot_dimension_numbers<[1], [0], [0], [1], [0, 0, 1, 1], [], []>} : vector<16x32xf32>, vector<32x3xf32>, vector<16x3xf32> -> vector<16x3xf32>
    %c0_88 = arith.constant 0 : index
    %c0_89 = arith.constant 0 : index
    %279 = vector.load %arg12[%c0_88, %c0_89] : memref<1x3xf32, #tpu.memory_space<vmem>>, vector<1x3xf32>
    %280 = vector.broadcast %279 : vector<1x3xf32> to vector<16x3xf32>
    %281 = arith.addf %278, %280 : vector<16x3xf32>
    %c0_90 = arith.constant 0 : index
    %c0_91 = arith.constant 0 : index
    %c0_92 = arith.constant 0 : index
    %282 = vector.load %arg13[%c0_90, %c0_91, %c0_92] : memref<1x16x3xf32, #tpu.memory_space<vmem>>, vector<1x16x3xf32>
    %283 = vector.shape_cast %282 : vector<1x16x3xf32> to vector<16x3xf32>
    %284 = vector.shape_cast %281 : vector<16x3xf32> to vector<1x16x3xf32>
    tpu.vector_store %arg13[%c0_90, %c0_91, %c0_92], %284 {strides = array<i32>} : memref<1x16x3xf32, #tpu.memory_space<vmem>>, vector<1x16x3xf32>,
    return
  }
  func.func @transform_0(%arg0: i32) -> (i32, i32, i32) {
    %c0_i32 = arith.constant 0 : i32
    %c0_i32_0 = arith.constant 0 : i32
    %c0_i32_1 = arith.constant 0 : i32
    return %arg0, %c0_i32, %c0_i32_0 : i32, i32, i32
  }
  func.func @transform_1(%arg0: i32) -> (i32, i32) {
    %c0_i32 = arith.constant 0 : i32
    %c0_i32_0 = arith.constant 0 : i32
    %c0_i32_1 = arith.constant 0 : i32
    return %c0_i32, %c0_i32_0 : i32, i32
  }
  func.func @transform_2(%arg0: i32) -> (i32, i32) {
    %c0_i32 = arith.constant 0 : i32
    %c0_i32_0 = arith.constant 0 : i32
    %c0_i32_1 = arith.constant 0 : i32
    return %c0_i32, %c0_i32_0 : i32, i32
  }
  func.func @transform_3(%arg0: i32) -> (i32, i32) {
    %c0_i32 = arith.constant 0 : i32
    %c0_i32_0 = arith.constant 0 : i32
    %c0_i32_1 = arith.constant 0 : i32
    return %c0_i32, %c0_i32_0 : i32, i32
  }
  func.func @transform_4(%arg0: i32) -> (i32, i32) {
    %c0_i32 = arith.constant 0 : i32
    %c0_i32_0 = arith.constant 0 : i32
    %c0_i32_1 = arith.constant 0 : i32
    return %c0_i32, %c0_i32_0 : i32, i32
  }
  func.func @transform_5(%arg0: i32) -> (i32, i32) {
    %c0_i32 = arith.constant 0 : i32
    %c0_i32_0 = arith.constant 0 : i32
    %c0_i32_1 = arith.constant 0 : i32
    return %c0_i32, %c0_i32_0 : i32, i32
  }
  func.func @transform_6(%arg0: i32) -> (i32, i32) {
    %c0_i32 = arith.constant 0 : i32
    %c0_i32_0 = arith.constant 0 : i32
    %c0_i32_1 = arith.constant 0 : i32
    return %c0_i32, %c0_i32_0 : i32, i32
  }
  func.func @transform_7(%arg0: i32) -> (i32, i32) {
    %c0_i32 = arith.constant 0 : i32
    %c0_i32_0 = arith.constant 0 : i32
    %c0_i32_1 = arith.constant 0 : i32
    return %c0_i32, %c0_i32_0 : i32, i32
  }
  func.func @transform_8(%arg0: i32) -> (i32, i32) {
    %c0_i32 = arith.constant 0 : i32
    %c0_i32_0 = arith.constant 0 : i32
    %c0_i32_1 = arith.constant 0 : i32
    return %c0_i32, %c0_i32_0 : i32, i32
  }
  func.func @transform_9(%arg0: i32) -> (i32, i32) {
    %c0_i32 = arith.constant 0 : i32
    %c0_i32_0 = arith.constant 0 : i32
    %c0_i32_1 = arith.constant 0 : i32
    return %c0_i32, %c0_i32_0 : i32, i32
  }
  func.func @transform_10(%arg0: i32) -> (i32, i32) {
    %c0_i32 = arith.constant 0 : i32
    %c0_i32_0 = arith.constant 0 : i32
    %c0_i32_1 = arith.constant 0 : i32
    return %c0_i32, %c0_i32_0 : i32, i32
  }
  func.func @transform_11(%arg0: i32) -> (i32, i32) {
    %c0_i32 = arith.constant 0 : i32
    %c0_i32_0 = arith.constant 0 : i32
    %c0_i32_1 = arith.constant 0 : i32
    return %c0_i32, %c0_i32_0 : i32, i32
  }
  func.func @transform_12(%arg0: i32) -> (i32, i32, i32) {
    %c0_i32 = arith.constant 0 : i32
    %c0_i32_0 = arith.constant 0 : i32
    %c0_i32_1 = arith.constant 0 : i32
    return %arg0, %c0_i32, %c0_i32_0 : i32, i32, i32
  }
}

</mosaic_0001>

<bundles_post_ra>
// kernel: tpu_custom_call.1
= control target key start
LH: loop header
LB: loop body
LE: loop exit
PB: predicated region body
PF: predicated region fallthrough
CT: control target
= control target key end

     0   :  { %s6474_s21 = smov 0   ;;  %s7229_s0 = inlined_call_operand.vmem [shape: f32[2,16,8], index: 0, kind: input, shape index: {}]   ;;  %s7230_s1 = inlined_call_operand.vmem [shape: f32[16,16], index: 1, kind: input, shape index: {}]   ;;  %s7231_s2 = inlined_call_operand.vmem [shape: f32[32,16], index: 2, kind: input, shape index: {}]   ;;  %s7232_s3 = inlined_call_operand.vmem [shape: f32[32,16], index: 3, kind: input, shape index: {}]   ;;  %s7233_s4 = inlined_call_operand.vmem [shape: f32[1,64], index: 4, kind: input, shape index: {}]   ;;  %s7234_s5 = inlined_call_operand.vmem [shape: f32[32,64], index: 5, kind: input, shape index: {}]   ;;  %s7235_s6 = inlined_call_operand.vmem [shape: f32[1,64], index: 6, kind: input, shape index: {}]   ;;  %s7236_s7 = inlined_call_operand.vmem [shape: f32[1,32], index: 7, kind: input, shape index: {}]   ;;  %s7237_s8 = inlined_call_operand.vmem [shape: f32[32,32], index: 8, kind: input, shape index: {}]   ;;  %s7238_s9 = inlined_call_operand.vmem [shape: f32[1,32], index: 9, kind: input, shape index: {}]   ;;  %s7239_s10 = inlined_call_operand.vmem [shape: f32[32,3], index: 10, kind: input, shape index: {}]   ;;  %s7240_s11 = inlined_call_operand.vmem [shape: f32[1,3], index: 11, kind: input, shape index: {}]   ;;  %s7241_s12 = inlined_call_operand.vmem [shape: f32[2,16,3], index: 12, kind: output, shape index: {}]  }
   0x1 LB: > { %s5089_s22 = sadd.s32 4294967295, %s6397_s21   ;;  %p5093_p0 = scmp.ge.s32.totalorder %s6397_s21, 1  ;;  %s6397_s21 = sphi %s6474_s21, %s22_s21  }
   0x2   : > { %p362_p1 = scmp.lt.s32.totalorder %s6397_s21, 3 }
   0x4   : > { %p363_p2 = pnand %p5093_p0, %p362_p1 }
   0x5   : > { %v6485_v0 = vld [vmem:[%s7230_s1] sm:$0xff] (!%p363_p2)  ;;  %vm434_vm0 = vcmask (!%p363_p2), 130048   ;;  %v6490_v1 = vld [vmem:[%s7230_s1 + $0x8] sm:$0xff] (!%p363_p2)  ;;  %p404_p3 = scmp.lt.s32.totalorder (!%p363_p2), %s5089_s22, 1  ;;  %v6399_v3 = vmov (!%p363_p2), 0.0   ;;  %v428_v5 = vld [vmem:[%s7234_s5 + $0x10] sm:$0xff] (!%p363_p2) }
   0x6   : > { %366 = sbr.rel (%p363_p2) target bundleno = 10259 (0x2813), region = 68  ;;  %v426_v2 = vld [vmem:[%s7234_s5] sm:$0xff] (!%p363_p2)  ;;  %5527 = vmatprep.subr.mxu1 (!%p363_p2), %v6399_v3  ;;  %5529 = vmatprep.mubr.msk.f32.mxu1 (!%p363_p2), %vm434_vm0, %v6485_v0  ;;  %v427_v4 = vld [vmem:[%s7234_s5 + $0x8] sm:$0xff] (!%p363_p2)  ;;  %v429_v6 = vld [vmem:[%s7234_s5 + $0x18] sm:$0xff] (!%p363_p2)  ;;  %v6400_v12 = vmov (!%p363_p2), 0   ;;  %vm631_vm1 = vcmask (!%p363_p2), 261120  }
   0x7   : > { %5528 = vmatpush3.msra.mxu1 (!%p363_p2), %v6399_v3  ;;  %5524 = vmatprep.mubr.msk.f32.mxu0 (!%p363_p2), %vm434_vm0, %v6485_v0  ;;  %v6510_v7 = vpack.c.bf16 (!%p363_p2), %v427_v4, %v426_v2  ;;  %v6512_v8 = vpack.c.bf16 (!%p363_p2), %v429_v6, %v428_v5  ;;  %v6539_v17 = vld [vmem:[%s7232_s3] sm:$0xff] (!%p363_p2)  ;;  %v6573_v40 = vld [vmem:[%s7232_s3 + $0x8] sm:$0xff] (!%p363_p2)  ;;  %v6583_v42 = vld [vmem:[%s7232_s3 + $0x10] sm:$0xff] (!%p363_p2)  ;;  %v6401_v44 = vmov (!%p363_p2), 1   ;;  %s6402_s28 = smov (!%p363_p2), 96   ;;  %vm5031_vm2 = vcmask (!%p363_p2), 23552  }
   0x8   : > { %5530 = vmatmul.mubr.msk.f32.vlgmr.msra.gmra.mrb[0].mxu1 (!%p363_p2), %vm434_vm0, %v6490_v1  ;;  %6266 = vset.pattern.permute.xlu0 (!%p363_p2), %v6400_v12  ;;  %v6546_v18 = vld [vmem:[%s7231_s2] sm:$0xff] (!%p363_p2)  ;;  %v6578_v41 = vld [vmem:[%s7231_s2 + $0x8] sm:$0xff] (!%p363_p2)  ;;  %v6594_v43 = vld [vmem:[%s7232_s3 + $0x18] sm:$0xff] (!%p363_p2) }
   0x9   : > { %5989 = vmatprep.subr.bf16.mxu1 (!%p363_p2), %v6510_v7  ;;  %v6555_v20 = vld [vmem:[%s7233_s4] ss:$0 sm:$0xff] (!%p363_p2)  ;;  %6268 = vset.pattern.permute.xlu1 (!%p363_p2), %v6401_v44  ;;  %v6601_v45 = vld [vmem:[%s7231_s2 + $0x10] sm:$0xff] (!%p363_p2)  ;;  %v6608_v46 = vld [vmem:[%s7231_s2 + $0x18] sm:$0xff] (!%p363_p2) }
   0xa   : > { %5991 = vmatpush3.bf16.msra.mxu1 (!%p363_p2), %v6510_v7  ;;  %v6566_v24 = vld [vmem:[%s7235_s6] ss:$0 sm:$0xff] (!%p363_p2)  ;;  %v431_v54 = vld [vmem:[%s7237_s8 + $0x8] sm:$0xff] (!%p363_p2)  ;;  %v432_v56 = vld [vmem:[%s7237_s8 + $0x10] sm:$0xff] (!%p363_p2) }
   0xb   : > { %5993 = vmatprep.subr.bf16.mxu1 (!%p363_p2), %v6512_v8  ;;  %v430_v53 = vld [vmem:[%s7237_s8] sm:$0xff] (!%p363_p2)  ;;  %v433_v57 = vld [vmem:[%s7237_s8 + $0x18] sm:$0xff] (!%p363_p2) }
   0xc   : > { %v6626_v55 = vpack.c.bf16 (!%p363_p2), %v431_v54, %v430_v53  ;;  %v6634_v58 = vpack.c.bf16 (!%p363_p2), %v433_v57, %v432_v56 }
   0xd   : > { %s7243_s22 = smov (!%p404_p3, %s5089_s22), 1 }
   0xe   : > { %s5253_s17 = sshll.u32 %s7243_s22, 4  ;;  %5995 = vmatpush3.bf16.msra.mxu1 %v6512_v8 }
   0xf   : > { %s408_s20 = scalar_lea.vmem %s7229_s0, %s5253_s17  ;;  %s413_s23 = scalar_lea.vmem %s7241_s12, %s5253_s17 }
  0x10   : > { %v416_v9 = vld [vmem:[%s408_s20] sm:$0xff]  ;;  %v417_v10 = vld [vmem:[%s408_s20 + $0x8] sm:$0xff] }
  0x11   : > { %v5984_v11 = vpack.c.bf16 %v417_v10, %v416_v9  ;;  %v6651_v10 = vld [vmem:[%s7236_s7] ss:$0 sm:$0xff] }
  0x13   : > { %5985 = vmatprep.subr.bf16.mxu0 %v5984_v11 }
  0x14   : > { %5987 = vmatpush3.bf16.msra.mxu0 %v5984_v11 }
  0x17   : > { %5525 = vmatmul.mubr.msk.f32.vlgmr.msra.gmra.mrb[0].mxu0 %vm434_vm0, %v6490_v1 }
  0x18   : > { %5547 = vmatprep.mubr.msk.f32.mxu0 %vm434_vm0, %v6546_v18 }
  0xdb   : > { %v5531_v13 = vpop.f32.mrb[0].mxu1 }
  0xdc   : > { %v622_v14 = vpop.f32.mrb[1].mxu1 }
  0xdd   : > { %5540 = vmatprep.mubr.msk.f32.mxu1 %vm631_vm1, %v622_v14 }
  0xde   : > { %5541 = vmatmul.mubr.msk.f32.vlgmr.msra.gmra.mrb[2].mxu1 %vm631_vm1, %v5531_v13  ;;  %v6660_v13 = vld [vmem:[%s7238_s9] ss:$0 sm:$0xff] }
  0xdf   : > { %5557 = vmatprep.mubr.msk.f32.mxu1 %vm434_vm0, %v6539_v17 }
  0xea   : > { %v6530_v15 = vpop.f32.mrb[0].mxu0 }
  0xeb   : > { %v6532_v16 = vpop.f32.mrb[1].mxu0 }
  0xec   : > { %546 = vperm.xlu0 %6266, %v6532_v16  }
  0xf0   : > { %551 = vperm.xlu0 %6266, %v6530_v15  }
  0xf4   : > { %6267 = vset.pattern.permute.xlu0 %v6401_v44 }
 0x16b   : > { %v6550_v19 = vpop.permute.xlu0 %546 }
 0x16c   : > { %v554_v23 = vmul.f32 %v6555_v20, %v6550_v19  ;;  %v943_v12 = vmul.f32 %v6651_v10, %v6550_v19 }
 0x16f   : > { %v6557_v21 = vpop.permute.xlu0 %551 }
 0x170   : > { %v555_v22 = vmul.f32 %v6555_v20, %v6557_v21  ;;  %v944_v11 = vmul.f32 %v6651_v10, %v6557_v21 }
 0x1b1   : > { %v5542_v25 = vpop.f32.mrb[2].mxu1 }
 0x1b2   : > { %v714_v26 = vadd.f32 %v5542_v25, %v555_v22  ;;  %v704_v27 = vpop.f32.mrb[3].mxu1 }
 0x1b3   : > { %v713_v28 = vadd.f32 %v704_v27, %v554_v23 }
 0x1b4   : > { %v716_v29 = vadd.f32 %v6566_v24, %v714_v26 }
 0x1b5   : > { %v715_v30 = vadd.f32 %v6566_v24, %v713_v28 }
 0x1b6   : > { %v5109_v31 = vmul.f32 -1.442695, %v716_v29 }
 0x1b7   : > { %v5108_v32 = vmul.f32 -1.442695, %v715_v30 }
 0x1b8   : > { %6281 = vpow2.f32 %v5109_v31 }
 0x1b9   : > { %6283 = vpow2.f32 %v5108_v32 }
 0x1c2   : > { %v6282_v33 = vpop.eup %6281 }
 0x1c3   : > { %v6284_v34 = vpop.eup %6283  ;;  %v724_v35 = vadd.f32 1.0, %v6282_v33 }
 0x1c4   : > { %v723_v36 = vadd.f32 1.0, %v6284_v34 }
 0x1c5   : > { %6285 = vrcp.f32 %v724_v35 }
 0x1c6   : > { %6287 = vrcp.f32 %v723_v36 }
 0x1cf   : > { %v6286_v37 = vpop.eup %6285 }
 0x1d0   : > { %v6288_v38 = vpop.eup %6287 }
 0x1d1   : > { %v5996_v39 = vpack.c.bf16 %v6286_v37, %v6288_v38 }
 0x1d3   : > { %5997 = vmatprep.subr.bf16.mxu0 %v5996_v39  ;;  %6001 = vmatprep.subr.bf16.mxu1 %v5996_v39 }
 0x1d4   : > { %5999 = vmatpush3.bf16.msra.mxu0 %v5996_v39  ;;  %6003 = vmatpush3.bf16.msra.mxu1 %v5996_v39 }
 0x1d5   : > { %6009 = vmatprep.subr.bf16.mxu1 %v6626_v55 }
 0x1d7   : > { %5558 = vmatmul.mubr.msk.f32.vlgmr.msra.gmra.mrb[4].mxu1 %vm434_vm0, %v6573_v40  ;;  %5548 = vmatmul.mubr.msk.f32.vlgmr.msra.gmra.mrb[2].mxu0 %vm434_vm0, %v6578_v41 }
 0x1d8   : > { %5560 = vmatprep.mubr.msk.f32.mxu1 %vm434_vm0, %v6583_v42  ;;  %5550 = vmatprep.mubr.msk.f32.mxu0 %vm434_vm0, %v6601_v45 }
 0x1d9   : > { %6011 = vmatpush3.bf16.msra.mxu1 %v6626_v55 }
 0x1da   : > { %6013 = vmatprep.subr.bf16.mxu1 %v6634_v58 }
 0x1db   : > { %5561 = vmatmul.mubr.msk.f32.gmra.mrb[6].mxu1 %vm434_vm0, %v6594_v43  ;;  %5551 = vmatmul.mubr.msk.f32.gmra.mrb[4].mxu0 %vm434_vm0, %v6608_v46 }
 0x1dc   : > { %5567 = vmatprep.mubr.msk.f32.mxu0 %vm434_vm0, %v6485_v0 }
 0x1dd   : > { %6015 = vmatpush3.bf16.msra.mxu1 %v6634_v58 }
 0x2aa   : > { %v5559_v47 = vpop.f32.mrb[4].mxu1  ;;  %v5549_v48 = vpop.f32.mrb[2].mxu0 }
 0x2ab   : > { %v904_v49 = vpop.f32.mrb[5].mxu1  ;;  %v807_v50 = vpop.f32.mrb[3].mxu0 }
 0x2ac   : > { %927 = vrot.lane.b32.xlu1 %v904_v49, %s6402_s28 }
 0x2ae   : > { %v5562_v51 = vpop.f32.mrb[6].mxu1  ;;  %v5552_v4 = vpop.f32.mrb[4].mxu0 }
 0x2af   : > { %v914_v52 = vpop.f32.mrb[7].mxu1  ;;  %v817_v5 = vpop.f32.mrb[5].mxu0 }
 0x2b0   : > { %929 = vrot.lane.b32.xlu1 %v5559_v47, %s6402_s28  ;;  %931 = vrot.lane.b32.xlu0 %v914_v52, %s6402_s28 }
 0x2b4   : > { %933 = vrot.lane.b32.xlu1 %v5562_v51, %s6402_s28  ;;  %1118 = vperm.xlu0 %6267, %v6532_v16  }
 0x2b8   : > { %1122 = vperm.xlu1 %6268, %v6530_v15  }
 0x31e   : > { %v928_v59 = vpop.permute.xlu1 %927 }
 0x31f   : > { %v939_v60 = vadd.f32 %v928_v59, %v807_v50 }
 0x321   : > { %v945_v63 = vmul.f32 0.0, %v939_v60 }
 0x322   : > { %v930_v61 = vpop.permute.xlu1 %929  ;;  %v932_v21 = vpop.permute.xlu0 %931 }
 0x323   : > { %v940_v62 = vadd.f32 %v5549_v48, %v930_v61  ;;  %v941_v30 = vadd.f32 %v932_v21, %v817_v5 }
 0x325   : > { %v946_v2 = vmul.f32 0.0, %v940_v62  ;;  %v1111_v32 = vsub.f32 1.0, %v941_v30  ;;  %v1109_v36 = vmul.f32 0.0, %v941_v30 }
 0x326   : > { %v934_v28 = vpop.permute.xlu1 %933 }
 0x327   : > { %v6004_v3 = vpack.c.bf16 %v946_v2, %v945_v63  ;;  %v942_v29 = vadd.f32 %v5552_v4, %v934_v28 }
 0x329   : > { %6005 = vmatprep.subr.bf16.mxu0 %v6004_v3  ;;  %v1112_v19 = vsub.f32 1.0, %v942_v29  ;;  %v1110_v34 = vmul.f32 0.0, %v942_v29 }
 0x32a   : > { %6007 = vmatpush3.bf16.msra.mxu0 %v6004_v3 }
 0x32d   : > { %5568 = vmatmul.mubr.msk.f32.vlgmr.msra.gmra.mrb[6].mxu0 %vm434_vm0, %v6490_v1 }
 0x32e   : > { %5585 = vmatprep.mubr.msk.f32.mxu0 %vm434_vm0, %v6485_v0 }
 0x333   : > { %v6682_v50 = vpop.permute.xlu0 %1118 }
 0x334   : > { %v1125_v52 = vmul.f32 %v6555_v20, %v6682_v50 }
 0x337   : > { %v6680_v49 = vpop.permute.xlu1 %1122 }
 0x338   : > { %v1126_v51 = vmul.f32 %v6555_v20, %v6680_v49 }
 0x400   : > { %v5569_v6 = vpop.f32.mrb[6].mxu0 }
 0x401   : > { %v1013_v9 = vpop.f32.mrb[7].mxu0 }
 0x402   : > { %5578 = vmatprep.mubr.msk.f32.mxu1 %vm631_vm1, %v1013_v9 }
 0x403   : > { %5579 = vmatmul.mubr.msk.f32.vlgmr.msra.gmra.mrb[8].mxu1 %vm631_vm1, %v5569_v6 }
 0x404   : > { %5603 = vmatprep.mubr.msk.f32.mxu1 %vm434_vm0, %v6546_v18 }
 0x4d6   : > { %v5580_v14 = vpop.f32.mrb[8].mxu1 }
 0x4d7   : > { %v1104_v22 = vadd.f32 %v5580_v14, %v944_v11  ;;  %v1094_v23 = vpop.f32.mrb[9].mxu1  ;;  %v6403_v11 = vmov 2  }
 0x4d8   : > { %v1103_v25 = vadd.f32 %v1094_v23, %v943_v12  ;;  %6270 = vset.pattern.permute.xlu0 %v6403_v11  ;;  %6269 = vset.pattern.permute.xlu1 %v6403_v11 }
 0x4d9   : > { %v1106_v26 = vadd.f32 %v6660_v13, %v1104_v22 }
 0x4da   : > { %v1105_v27 = vadd.f32 %v6660_v13, %v1103_v25 }
 0x4db   : > { %6289 = vtanh.f32 %v1106_v26 }
 0x4dc   : > { %6291 = vtanh.f32 %v1105_v27 }
 0x4e5   : > { %v6290_v31 = vpop.eup %6289 }
 0x4e6   : > { %v6292_v33 = vpop.eup %6291  ;;  %v1114_v35 = vmul.f32 %v6290_v31, %v1112_v19 }
 0x4e7   : > { %v1113_v37 = vmul.f32 %v6292_v33, %v1111_v32 }
 0x4e8   : > { %v6664_v38 = vadd.f32 %v1114_v35, %v1110_v34 }
 0x4e9   : > { %v6666_v39 = vadd.f32 %v1113_v37, %v1109_v36  ;;  %v1490_v36 = vmul.f32 %v6651_v10, %v6680_v49  ;;  %v1489_v37 = vmul.f32 %v6651_v10, %v6682_v50 }
 0x4eb   : > { %v6016_v44 = vpack.c.bf16 %v6664_v38, %v6666_v39 }
 0x4ed   : > { %6017 = vmatprep.subr.bf16.mxu0 %v6016_v44 }
 0x4ee   : > { %6019 = vmatpush3.bf16.msra.mxu0 %v6016_v44 }
 0x4ef   : > { %6021 = vmatprep.subr.bf16.mxu0 %v6510_v7 }
 0x4f1   : > { %5586 = vmatmul.mubr.msk.f32.vlgmr.msra.gmra.mrb[8].mxu0 %vm434_vm0, %v6490_v1 }
 0x4f2   : > { %6023 = vmatpush3.bf16.msra.mxu0 %v6510_v7 }
 0x4f3   : > { %6025 = vmatprep.subr.bf16.mxu0 %v6512_v8 }
 0x4f6   : > { %6027 = vmatpush3.bf16.msra.mxu0 %v6512_v8 }
 0x5c4   : > { %v5587_v47 = vpop.f32.mrb[8].mxu0 }
 0x5c5   : > { %v1193_v48 = vpop.f32.mrb[9].mxu0 }
 0x5c6   : > { %5596 = vmatprep.mubr.msk.f32.mxu0 %vm631_vm1, %v1193_v48 }
 0x5c7   : > { %5597 = vmatmul.mubr.msk.f32.vlgmr.msra.gmra.mrb[10].mxu0 %vm631_vm1, %v5587_v47 }
 0x5c8   : > { %5613 = vmatprep.mubr.msk.f32.mxu0 %vm434_vm0, %v6539_v17 }
 0x69a   : > { %v5598_v53 = vpop.f32.mrb[10].mxu0 }
 0x69b   : > { %v1284_v54 = vadd.f32 %v5598_v53, %v1126_v51  ;;  %v1274_v56 = vpop.f32.mrb[11].mxu0 }
 0x69c   : > { %v1283_v57 = vadd.f32 %v1274_v56, %v1125_v52 }
 0x69d   : > { %v1286_v59 = vadd.f32 %v6566_v24, %v1284_v54 }
 0x69e   : > { %v1285_v60 = vadd.f32 %v6566_v24, %v1283_v57 }
 0x69f   : > { %v5127_v61 = vmul.f32 -1.442695, %v1286_v59 }
 0x6a0   : > { %v5126_v62 = vmul.f32 -1.442695, %v1285_v60 }
 0x6a1   : > { %6293 = vpow2.f32 %v5127_v61 }
 0x6a2   : > { %6295 = vpow2.f32 %v5126_v62 }
 0x6ab   : > { %v6294_v63 = vpop.eup %6293 }
 0x6ac   : > { %v6296_v2 = vpop.eup %6295  ;;  %v1294_v3 = vadd.f32 1.0, %v6294_v63 }
 0x6ad   : > { %v1293_v4 = vadd.f32 1.0, %v6296_v2 }
 0x6ae   : > { %6297 = vrcp.f32 %v1294_v3 }
 0x6af   : > { %6299 = vrcp.f32 %v1293_v4 }
 0x6b8   : > { %v6298_v5 = vpop.eup %6297 }
 0x6b9   : > { %v6300_v6 = vpop.eup %6299 }
 0x6ba   : > { %v6028_v9 = vpack.c.bf16 %v6298_v5, %v6300_v6 }
 0x6bc   : > { %6029 = vmatprep.subr.bf16.mxu1 %v6028_v9  ;;  %6033 = vmatprep.subr.bf16.mxu0 %v6028_v9 }
 0x6bd   : > { %6031 = vmatpush3.bf16.msra.mxu1 %v6028_v9  ;;  %6035 = vmatpush3.bf16.msra.mxu0 %v6028_v9 }
 0x6be   : > { %6041 = vmatprep.subr.bf16.mxu0 %v6626_v55 }
 0x6c0   : > { %5614 = vmatmul.mubr.msk.f32.vlgmr.msra.gmra.mrb[12].mxu0 %vm434_vm0, %v6573_v40  ;;  %5604 = vmatmul.mubr.msk.f32.vlgmr.msra.gmra.mrb[10].mxu1 %vm434_vm0, %v6578_v41 }
 0x6c1   : > { %5616 = vmatprep.mubr.msk.f32.mxu0 %vm434_vm0, %v6583_v42  ;;  %5606 = vmatprep.mubr.msk.f32.mxu1 %vm434_vm0, %v6601_v45 }
 0x6c2   : > { %6043 = vmatpush3.bf16.msra.mxu0 %v6626_v55 }
 0x6c3   : > { %6045 = vmatprep.subr.bf16.mxu0 %v6634_v58 }
 0x6c4   : > { %5617 = vmatmul.mubr.msk.f32.gmra.mrb[14].mxu0 %vm434_vm0, %v6594_v43  ;;  %5607 = vmatmul.mubr.msk.f32.gmra.mrb[12].mxu1 %vm434_vm0, %v6608_v46 }
 0x6c5   : > { %5623 = vmatprep.mubr.msk.f32.mxu1 %vm434_vm0, %v6485_v0 }
 0x6c6   : > { %6047 = vmatpush3.bf16.msra.mxu0 %v6634_v58 }
 0x793   : > { %v5615_v12 = vpop.f32.mrb[12].mxu0  ;;  %v5605_v14 = vpop.f32.mrb[10].mxu1 }
 0x794   : > { %1475 = vrot.lane.b32.xlu0 %v5615_v12, %s6402_s28  ;;  %v1450_v22 = vpop.f32.mrb[13].mxu0  ;;  %v1365_v23 = vpop.f32.mrb[11].mxu1 }
 0x795   : > { %1473 = vrot.lane.b32.xlu1 %v1450_v22, %s6402_s28 }
 0x797   : > { %v5618_v25 = vpop.f32.mrb[14].mxu0  ;;  %v5608_v26 = vpop.f32.mrb[12].mxu1 }
 0x798   : > { %1479 = vrot.lane.b32.xlu0 %v5618_v25, %s6402_s28  ;;  %v1460_v27 = vpop.f32.mrb[15].mxu0  ;;  %v1375_v28 = vpop.f32.mrb[13].mxu1 }
 0x799   : > { %1477 = vrot.lane.b32.xlu1 %v1460_v27, %s6402_s28 }
 0x79c   : > { %1668 = vperm.xlu0 %6270, %v6530_v15  }
 0x79d   : > { %1664 = vperm.xlu1 %6269, %v6532_v16  }
 0x806   : > { %v1476_v21 = vpop.permute.xlu0 %1475 }
 0x807   : > { %v1486_v29 = vadd.f32 %v5605_v14, %v1476_v21  ;;  %v1474_v30 = vpop.permute.xlu1 %1473 }
 0x808   : > { %v1485_v19 = vadd.f32 %v1474_v30, %v1365_v23 }
 0x809   : > { %v1492_v31 = vmul.f32 %v1486_v29, %v6664_v38 }
 0x80a   : > { %v1491_v32 = vmul.f32 %v1485_v19, %v6666_v39  ;;  %v1480_v54 = vpop.permute.xlu0 %1479 }
 0x80b   : > { %v1478_v56 = vpop.permute.xlu1 %1477  ;;  %v1488_v57 = vadd.f32 %v5608_v26, %v1480_v54 }
 0x80c   : > { %v6036_v33 = vpack.c.bf16 %v1492_v31, %v1491_v32  ;;  %v1487_v59 = vadd.f32 %v1478_v56, %v1375_v28 }
 0x80d   : > { %v1658_v60 = vsub.f32 1.0, %v1488_v57  ;;  %v1656_v50 = vmul.f32 %v1488_v57, %v6664_v38 }
 0x80e   : > { %6037 = vmatprep.subr.bf16.mxu1 %v6036_v33  ;;  %v1657_v49 = vsub.f32 1.0, %v1487_v59  ;;  %v1655_v2 = vmul.f32 %v1487_v59, %v6666_v39 }
 0x80f   : > { %6039 = vmatpush3.bf16.msra.mxu1 %v6036_v33 }
 0x812   : > { %5624 = vmatmul.mubr.msk.f32.vlgmr.msra.gmra.mrb[14].mxu1 %vm434_vm0, %v6490_v1 }
 0x813   : > { %5641 = vmatprep.mubr.msk.f32.mxu1 %vm434_vm0, %v6485_v0 }
 0x81b   : > { %v6748_v9 = vpop.permute.xlu0 %1668 }
 0x81c   : > { %v6750_v11 = vpop.permute.xlu1 %1664  ;;  %v1672_v12 = vmul.f32 %v6555_v20, %v6748_v9 }
 0x81d   : > { %v1671_v14 = vmul.f32 %v6555_v20, %v6750_v11 }
 0x8e5   : > { %v5625_v34 = vpop.f32.mrb[14].mxu1 }
 0x8e6   : > { %v1559_v35 = vpop.f32.mrb[15].mxu1 }
 0x8e7   : > { %5634 = vmatprep.mubr.msk.f32.mxu0 %vm631_vm1, %v1559_v35 }
 0x8e8   : > { %5635 = vmatmul.mubr.msk.f32.vlgmr.msra.gmra.mrb[16].mxu0 %vm631_vm1, %v5625_v34 }
 0x8e9   : > { %5659 = vmatprep.mubr.msk.f32.mxu0 %vm434_vm0, %v6546_v18 }
 0x9bb   : > { %v5636_v44 = vpop.f32.mrb[16].mxu0 }
 0x9bc   : > { %v1650_v47 = vadd.f32 %v5636_v44, %v1490_v36  ;;  %v1640_v48 = vpop.f32.mrb[17].mxu0  ;;  %v6404_v36 = vmov 3  }
 0x9bd   : > { %v1649_v51 = vadd.f32 %v1640_v48, %v1489_v37  ;;  %6271 = vset.pattern.permute.xlu0 %v6404_v36  ;;  %6272 = vset.pattern.permute.xlu1 %v6404_v36 }
 0x9be   : > { %v1652_v52 = vadd.f32 %v6660_v13, %v1650_v47 }
 0x9bf   : > { %v1651_v53 = vadd.f32 %v6660_v13, %v1649_v51 }
 0x9c0   : > { %6301 = vtanh.f32 %v1652_v52 }
 0x9c1   : > { %6303 = vtanh.f32 %v1651_v53 }
 0x9ca   : > { %v6302_v61 = vpop.eup %6301 }
 0x9cb   : > { %v6304_v62 = vpop.eup %6303  ;;  %v1660_v63 = vmul.f32 %v6302_v61, %v1658_v60 }
 0x9cc   : > { %v1659_v3 = vmul.f32 %v6304_v62, %v1657_v49 }
 0x9cd   : > { %v6732_v4 = vadd.f32 %v1660_v63, %v1656_v50 }
 0x9ce   : > { %v6734_v5 = vadd.f32 %v1659_v3, %v1655_v2  ;;  %v2036_v2 = vmul.f32 %v6651_v10, %v6748_v9  ;;  %v2035_v3 = vmul.f32 %v6651_v10, %v6750_v11 }
 0x9d0   : > { %v6048_v6 = vpack.c.bf16 %v6732_v4, %v6734_v5 }
 0x9d2   : > { %6049 = vmatprep.subr.bf16.mxu1 %v6048_v6 }
 0x9d3   : > { %6051 = vmatpush3.bf16.msra.mxu1 %v6048_v6 }
 0x9d4   : > { %6053 = vmatprep.subr.bf16.mxu1 %v6510_v7 }
 0x9d6   : > { %5642 = vmatmul.mubr.msk.f32.vlgmr.msra.gmra.mrb[16].mxu1 %vm434_vm0, %v6490_v1 }
 0x9d7   : > { %6055 = vmatpush3.bf16.msra.mxu1 %v6510_v7 }
 0x9d8   : > { %6057 = vmatprep.subr.bf16.mxu1 %v6512_v8 }
 0x9db   : > { %6059 = vmatpush3.bf16.msra.mxu1 %v6512_v8 }
 0xaa9   : > { %v5643_v38 = vpop.f32.mrb[16].mxu1 }
 0xaaa   : > { %v1739_v39 = vpop.f32.mrb[17].mxu1 }
 0xaab   : > { %5652 = vmatprep.mubr.msk.f32.mxu1 %vm631_vm1, %v1739_v39 }
 0xaac   : > { %5653 = vmatmul.mubr.msk.f32.vlgmr.msra.gmra.mrb[18].mxu1 %vm631_vm1, %v5643_v38 }
 0xaad   : > { %5669 = vmatprep.mubr.msk.f32.mxu1 %vm434_vm0, %v6539_v17 }
 0xb7f   : > { %v5654_v22 = vpop.f32.mrb[18].mxu1 }
 0xb80   : > { %v1830_v23 = vadd.f32 %v5654_v22, %v1672_v12  ;;  %v1820_v25 = vpop.f32.mrb[19].mxu1 }
 0xb81   : > { %v1829_v26 = vadd.f32 %v1820_v25, %v1671_v14 }
 0xb82   : > { %v1832_v27 = vadd.f32 %v6566_v24, %v1830_v23 }
 0xb83   : > { %v1831_v28 = vadd.f32 %v6566_v24, %v1829_v26 }
 0xb84   : > { %v5145_v21 = vmul.f32 -1.442695, %v1832_v27 }
 0xb85   : > { %v5144_v29 = vmul.f32 -1.442695, %v1831_v28 }
 0xb86   : > { %6305 = vpow2.f32 %v5145_v21 }
 0xb87   : > { %6307 = vpow2.f32 %v5144_v29 }
 0xb90   : > { %v6306_v30 = vpop.eup %6305 }
 0xb91   : > { %v6308_v19 = vpop.eup %6307  ;;  %v1840_v31 = vadd.f32 1.0, %v6306_v30 }
 0xb92   : > { %v1839_v32 = vadd.f32 1.0, %v6308_v19 }
 0xb93   : > { %6309 = vrcp.f32 %v1840_v31 }
 0xb94   : > { %6311 = vrcp.f32 %v1839_v32 }
 0xb9d   : > { %v6310_v33 = vpop.eup %6309 }
 0xb9e   : > { %v6312_v34 = vpop.eup %6311 }
 0xb9f   : > { %v6060_v35 = vpack.c.bf16 %v6310_v33, %v6312_v34 }
 0xba1   : > { %6061 = vmatprep.subr.bf16.mxu0 %v6060_v35  ;;  %6065 = vmatprep.subr.bf16.mxu1 %v6060_v35 }
 0xba2   : > { %6063 = vmatpush3.bf16.msra.mxu0 %v6060_v35  ;;  %6067 = vmatpush3.bf16.msra.mxu1 %v6060_v35 }
 0xba3   : > { %6073 = vmatprep.subr.bf16.mxu1 %v6626_v55 }
 0xba5   : > { %5670 = vmatmul.mubr.msk.f32.vlgmr.msra.gmra.mrb[20].mxu1 %vm434_vm0, %v6573_v40  ;;  %5660 = vmatmul.mubr.msk.f32.vlgmr.msra.gmra.mrb[18].mxu0 %vm434_vm0, %v6578_v41 }
 0xba6   : > { %5672 = vmatprep.mubr.msk.f32.mxu1 %vm434_vm0, %v6583_v42  ;;  %5662 = vmatprep.mubr.msk.f32.mxu0 %vm434_vm0, %v6601_v45 }
 0xba7   : > { %6075 = vmatpush3.bf16.msra.mxu1 %v6626_v55 }
 0xba8   : > { %6077 = vmatprep.subr.bf16.mxu1 %v6634_v58 }
 0xba9   : > { %5673 = vmatmul.mubr.msk.f32.gmra.mrb[22].mxu1 %vm434_vm0, %v6594_v43  ;;  %5663 = vmatmul.mubr.msk.f32.gmra.mrb[20].mxu0 %vm434_vm0, %v6608_v46 }
 0xbaa   : > { %5679 = vmatprep.mubr.msk.f32.mxu0 %vm434_vm0, %v6485_v0 }
 0xbab   : > { %6079 = vmatpush3.bf16.msra.mxu1 %v6634_v58 }
 0xc78   : > { %v5671_v37 = vpop.f32.mrb[20].mxu1  ;;  %v5661_v44 = vpop.f32.mrb[18].mxu0 }
 0xc79   : > { %v1996_v47 = vpop.f32.mrb[21].mxu1  ;;  %v1911_v48 = vpop.f32.mrb[19].mxu0 }
 0xc7a   : > { %2019 = vrot.lane.b32.xlu1 %v1996_v47, %s6402_s28 }
 0xc7c   : > { %v5674_v51 = vpop.f32.mrb[22].mxu1  ;;  %v5664_v52 = vpop.f32.mrb[20].mxu0 }
 0xc7d   : > { %v2006_v53 = vpop.f32.mrb[23].mxu1  ;;  %v1921_v54 = vpop.f32.mrb[21].mxu0 }
 0xc7e   : > { %2021 = vrot.lane.b32.xlu1 %v5671_v37, %s6402_s28  ;;  %2023 = vrot.lane.b32.xlu0 %v2006_v53, %s6402_s28 }
 0xc82   : > { %2025 = vrot.lane.b32.xlu1 %v5674_v51, %s6402_s28  ;;  %2210 = vperm.xlu0 %6271, %v6532_v16  }
 0xc86   : > { %2214 = vperm.xlu1 %6272, %v6530_v15  }
 0xcec   : > { %v2020_v56 = vpop.permute.xlu1 %2019 }
 0xced   : > { %v2031_v57 = vadd.f32 %v2020_v56, %v1911_v48 }
 0xcef   : > { %v2037_v61 = vmul.f32 %v2031_v57, %v6734_v5 }
 0xcf0   : > { %v2022_v59 = vpop.permute.xlu1 %2021  ;;  %v2024_v25 = vpop.permute.xlu0 %2023 }
 0xcf1   : > { %v2032_v60 = vadd.f32 %v5661_v44, %v2022_v59  ;;  %v2033_v27 = vadd.f32 %v2024_v25, %v1921_v54 }
 0xcf3   : > { %v2038_v49 = vmul.f32 %v2032_v60, %v6732_v4  ;;  %v2203_v9 = vsub.f32 1.0, %v2033_v27  ;;  %v2201_v19 = vmul.f32 %v2033_v27, %v6734_v5 }
 0xcf4   : > { %v2026_v23 = vpop.permute.xlu1 %2025 }
 0xcf5   : > { %v6068_v62 = vpack.c.bf16 %v2038_v49, %v2037_v61  ;;  %v2034_v26 = vadd.f32 %v5664_v52, %v2026_v23 }
 0xcf7   : > { %6069 = vmatprep.subr.bf16.mxu0 %v6068_v62  ;;  %v2204_v28 = vsub.f32 1.0, %v2034_v26  ;;  %v2202_v11 = vmul.f32 %v2034_v26, %v6732_v4 }
 0xcf8   : > { %6071 = vmatpush3.bf16.msra.mxu0 %v6068_v62 }
 0xcfb   : > { %5680 = vmatmul.mubr.msk.f32.vlgmr.msra.gmra.mrb[22].mxu0 %vm434_vm0, %v6490_v1 }
 0xcfc   : > { %5697 = vmatprep.mubr.msk.f32.mxu0 %vm434_vm0, %v6485_v0 }
 0xd01   : > { %v6818_v36 = vpop.permute.xlu0 %2210 }
 0xd02   : > { %v2217_v44 = vmul.f32 %v6555_v20, %v6818_v36 }
 0xd05   : > { %v6816_v35 = vpop.permute.xlu1 %2214 }
 0xd06   : > { %v2218_v37 = vmul.f32 %v6555_v20, %v6816_v35 }
 0xdce   : > { %v5681_v50 = vpop.f32.mrb[22].mxu0 }
 0xdcf   : > { %v2105_v63 = vpop.f32.mrb[23].mxu0 }
 0xdd0   : > { %5690 = vmatprep.mubr.msk.f32.mxu1 %vm631_vm1, %v2105_v63 }
 0xdd1   : > { %5691 = vmatmul.mubr.msk.f32.vlgmr.msra.gmra.mrb[24].mxu1 %vm631_vm1, %v5681_v50 }
 0xdd2   : > { %5715 = vmatprep.mubr.msk.f32.mxu1 %vm434_vm0, %v6546_v18 }
 0xea4   : > { %v5692_v6 = vpop.f32.mrb[24].mxu1 }
 0xea5   : > { %v2196_v38 = vadd.f32 %v5692_v6, %v2036_v2  ;;  %v2186_v39 = vpop.f32.mrb[25].mxu1  ;;  %v6405_v2 = vmov 4  }
 0xea6   : > { %v2195_v12 = vadd.f32 %v2186_v39, %v2035_v3  ;;  %6274 = vset.pattern.permute.xlu0 %v6405_v2  ;;  %6273 = vset.pattern.permute.xlu1 %v6405_v2 }
 0xea7   : > { %v2198_v14 = vadd.f32 %v6660_v13, %v2196_v38 }
 0xea8   : > { %v2197_v22 = vadd.f32 %v6660_v13, %v2195_v12 }
 0xea9   : > { %6313 = vtanh.f32 %v2198_v14 }
 0xeaa   : > { %6315 = vtanh.f32 %v2197_v22 }
 0xeb3   : > { %v6314_v21 = vpop.eup %6313 }
 0xeb4   : > { %v6316_v29 = vpop.eup %6315  ;;  %v2206_v30 = vmul.f32 %v6314_v21, %v2204_v28 }
 0xeb5   : > { %v2205_v31 = vmul.f32 %v6316_v29, %v2203_v9 }
 0xeb6   : > { %v6800_v32 = vadd.f32 %v2206_v30, %v2202_v11 }
 0xeb7   : > { %v6802_v33 = vadd.f32 %v2205_v31, %v2201_v19  ;;  %v2582_v19 = vmul.f32 %v6651_v10, %v6816_v35  ;;  %v2581_v31 = vmul.f32 %v6651_v10, %v6818_v36 }
 0xeb9   : > { %v6080_v34 = vpack.c.bf16 %v6800_v32, %v6802_v33 }
 0xebb   : > { %6081 = vmatprep.subr.bf16.mxu0 %v6080_v34 }
 0xebc   : > { %6083 = vmatpush3.bf16.msra.mxu0 %v6080_v34 }
 0xebd   : > { %6085 = vmatprep.subr.bf16.mxu0 %v6510_v7 }
 0xebf   : > { %5698 = vmatmul.mubr.msk.f32.vlgmr.msra.gmra.mrb[24].mxu0 %vm434_vm0, %v6490_v1 }
 0xec0   : > { %6087 = vmatpush3.bf16.msra.mxu0 %v6510_v7 }
 0xec1   : > { %6089 = vmatprep.subr.bf16.mxu0 %v6512_v8 }
 0xec4   : > { %6091 = vmatpush3.bf16.msra.mxu0 %v6512_v8 }
 0xf92   : > { %v5699_v4 = vpop.f32.mrb[24].mxu0 }
 0xf93   : > { %v2285_v5 = vpop.f32.mrb[25].mxu0 }
 0xf94   : > { %5708 = vmatprep.mubr.msk.f32.mxu0 %vm631_vm1, %v2285_v5 }
 0xf95   : > { %5709 = vmatmul.mubr.msk.f32.vlgmr.msra.gmra.mrb[26].mxu0 %vm631_vm1, %v5699_v4 }
 0xf96   : > { %5725 = vmatprep.mubr.msk.f32.mxu0 %vm434_vm0, %v6539_v17 }
0x1068   : > { %v5710_v47 = vpop.f32.mrb[26].mxu0 }
0x1069   : > { %v2376_v48 = vadd.f32 %v5710_v47, %v2218_v37  ;;  %v2366_v51 = vpop.f32.mrb[27].mxu0 }
0x106a   : > { %v2375_v52 = vadd.f32 %v2366_v51, %v2217_v44 }
0x106b   : > { %v2378_v53 = vadd.f32 %v6566_v24, %v2376_v48 }
0x106c   : > { %v2377_v54 = vadd.f32 %v6566_v24, %v2375_v52 }
0x106d   : > { %v5163_v56 = vmul.f32 -1.442695, %v2378_v53 }
0x106e   : > { %v5162_v57 = vmul.f32 -1.442695, %v2377_v54 }
0x106f   : > { %6317 = vpow2.f32 %v5163_v56 }
0x1070   : > { %6319 = vpow2.f32 %v5162_v57 }
0x1079   : > { %v6318_v59 = vpop.eup %6317 }
0x107a   : > { %v6320_v60 = vpop.eup %6319  ;;  %v2386_v61 = vadd.f32 1.0, %v6318_v59 }
0x107b   : > { %v2385_v49 = vadd.f32 1.0, %v6320_v60 }
0x107c   : > { %6321 = vrcp.f32 %v2386_v61 }
0x107d   : > { %6323 = vrcp.f32 %v2385_v49 }
0x1086   : > { %v6322_v62 = vpop.eup %6321 }
0x1087   : > { %v6324_v50 = vpop.eup %6323 }
0x1088   : > { %v6092_v63 = vpack.c.bf16 %v6322_v62, %v6324_v50 }
0x108a   : > { %6093 = vmatprep.subr.bf16.mxu1 %v6092_v63  ;;  %6097 = vmatprep.subr.bf16.mxu0 %v6092_v63 }
0x108b   : > { %6095 = vmatpush3.bf16.msra.mxu1 %v6092_v63  ;;  %6099 = vmatpush3.bf16.msra.mxu0 %v6092_v63 }
0x108c   : > { %6105 = vmatprep.subr.bf16.mxu0 %v6626_v55 }
0x108e   : > { %5726 = vmatmul.mubr.msk.f32.vlgmr.msra.gmra.mrb[28].mxu0 %vm434_vm0, %v6573_v40  ;;  %5716 = vmatmul.mubr.msk.f32.vlgmr.msra.gmra.mrb[26].mxu1 %vm434_vm0, %v6578_v41 }
0x108f   : > { %5728 = vmatprep.mubr.msk.f32.mxu0 %vm434_vm0, %v6583_v42  ;;  %5718 = vmatprep.mubr.msk.f32.mxu1 %vm434_vm0, %v6601_v45 }
0x1090   : > { %6107 = vmatpush3.bf16.msra.mxu0 %v6626_v55 }
0x1091   : > { %6109 = vmatprep.subr.bf16.mxu0 %v6634_v58 }
0x1092   : > { %5729 = vmatmul.mubr.msk.f32.gmra.mrb[30].mxu0 %vm434_vm0, %v6594_v43  ;;  %5719 = vmatmul.mubr.msk.f32.gmra.mrb[28].mxu1 %vm434_vm0, %v6608_v46 }
0x1093   : > { %5735 = vmatprep.mubr.msk.f32.mxu1 %vm434_vm0, %v6485_v0 }
0x1094   : > { %6111 = vmatpush3.bf16.msra.mxu0 %v6634_v58 }
0x1161   : > { %v5727_v3 = vpop.f32.mrb[28].mxu0  ;;  %v5717_v6 = vpop.f32.mrb[26].mxu1 }
0x1162   : > { %2567 = vrot.lane.b32.xlu0 %v5727_v3, %s6402_s28  ;;  %v2542_v38 = vpop.f32.mrb[29].mxu0  ;;  %v2457_v39 = vpop.f32.mrb[27].mxu1 }
0x1163   : > { %2565 = vrot.lane.b32.xlu1 %v2542_v38, %s6402_s28 }
0x1165   : > { %v5730_v12 = vpop.f32.mrb[30].mxu0  ;;  %v5720_v14 = vpop.f32.mrb[28].mxu1 }
0x1166   : > { %2571 = vrot.lane.b32.xlu0 %v5730_v12, %s6402_s28  ;;  %v2552_v22 = vpop.f32.mrb[31].mxu0  ;;  %v2467_v23 = vpop.f32.mrb[29].mxu1 }
0x1167   : > { %2569 = vrot.lane.b32.xlu1 %v2552_v22, %s6402_s28 }
0x116a   : > { %2760 = vperm.xlu0 %6274, %v6530_v15  }
0x116b   : > { %2756 = vperm.xlu1 %6273, %v6532_v16  }
0x11d4   : > { %v2568_v25 = vpop.permute.xlu0 %2567 }
0x11d5   : > { %v2578_v26 = vadd.f32 %v5717_v6, %v2568_v25  ;;  %v2566_v27 = vpop.permute.xlu1 %2565 }
0x11d6   : > { %v2577_v28 = vadd.f32 %v2566_v27, %v2457_v39 }
0x11d7   : > { %v2584_v21 = vmul.f32 %v2578_v26, %v6800_v32 }
0x11d8   : > { %v2583_v9 = vmul.f32 %v2577_v28, %v6802_v33  ;;  %v2572_v47 = vpop.permute.xlu0 %2571 }
0x11d9   : > { %v2570_v48 = vpop.permute.xlu1 %2569  ;;  %v2580_v51 = vadd.f32 %v5720_v14, %v2572_v47  ;;  %v6939_v47 = vld [vmem:[%s7231_s2] sm:$0xff] }
0x11da   : > { %v6100_v29 = vpack.c.bf16 %v2584_v21, %v2583_v9 }
0x11db   : > { %v2750_v52 = vsub.f32 1.0, %v2580_v51  ;;  %v2748_v36 = vmul.f32 %v2580_v51, %v6800_v32 }
0x11dc   : > { %6101 = vmatprep.subr.bf16.mxu1 %v6100_v29 }
0x11dd   : > { %6103 = vmatpush3.bf16.msra.mxu1 %v6100_v29 }
0x11e0   : > { %5736 = vmatmul.mubr.msk.f32.vlgmr.msra.gmra.mrb[30].mxu1 %vm434_vm0, %v6490_v1 }
0x11e1   : > { %5753 = vmatprep.mubr.msk.f32.mxu1 %vm434_vm0, %v6485_v0 }
0x11e9   : > { %v6884_v62 = vpop.permute.xlu0 %2760 }
0x11ea   : > { %v6886_v50 = vpop.permute.xlu1 %2756 }
0x11eb   : > { %v2763_v63 = vmul.f32 %v6555_v20, %v6886_v50  ;;  %v3127_v51 = vmul.f32 %v6651_v10, %v6886_v50 }
0x12b3   : > { %v5737_v11 = vpop.f32.mrb[30].mxu1 }
0x12b4   : > { %v2651_v30 = vpop.f32.mrb[31].mxu1 }
0x12b5   : > { %5746 = vmatprep.mubr.msk.f32.mxu0 %vm631_vm1, %v2651_v30 }
0x12b6   : > { %5747 = vmatmul.mubr.msk.f32.vlgmr.msra.gmra.mrb[32].mxu0 %vm631_vm1, %v5737_v11 }
0x12b7   : > { %5771 = vmatprep.mubr.msk.f32.mxu0 %vm434_vm0, %v6546_v18  ;;  %v2579_v18 = vadd.f32 %v2570_v48, %v2467_v23  ;;  %v3128_v48 = vmul.f32 %v6651_v10, %v6884_v62 }
0x12b9   : > { %v2749_v35 = vsub.f32 1.0, %v2579_v18  ;;  %v2747_v57 = vmul.f32 %v2579_v18, %v6802_v33 }
0x1389   : > { %v5748_v34 = vpop.f32.mrb[32].mxu0 }
0x138a   : > { %v2742_v4 = vadd.f32 %v5748_v34, %v2582_v19  ;;  %v2732_v5 = vpop.f32.mrb[33].mxu0 }
0x138b   : > { %v2741_v37 = vadd.f32 %v2732_v5, %v2581_v31 }
0x138c   : > { %v2744_v0 = vadd.f32 %v6660_v13, %v2742_v4 }
0x138d   : > { %v2743_v44 = vadd.f32 %v6660_v13, %v2741_v37  ;;  %v6928_v37 = vld [vmem:[%s7230_s1 + $0x8] sm:$0xff] }
0x138e   : > { %6325 = vtanh.f32 %v2744_v0 }
0x138f   : > { %6327 = vtanh.f32 %v2743_v44 }
0x1398   : > { %v6326_v53 = vpop.eup %6325 }
0x1399   : > { %v6328_v54 = vpop.eup %6327  ;;  %v2752_v56 = vmul.f32 %v6326_v53, %v2750_v52 }
0x139a   : > { %v2751_v59 = vmul.f32 %v6328_v54, %v2749_v35 }
0x139b   : > { %v6868_v60 = vadd.f32 %v2752_v56, %v2748_v36 }
0x139c   : > { %v6870_v61 = vadd.f32 %v2751_v59, %v2747_v57 }
0x139e   : > { %v6112_v49 = vpack.c.bf16 %v6868_v60, %v6870_v61 }
0x13a0   : > { %6113 = vmatprep.subr.bf16.mxu1 %v6112_v49 }
0x13a1   : > { %6115 = vmatpush3.bf16.msra.mxu1 %v6112_v49 }
0x13a2   : > { %6117 = vmatprep.subr.bf16.mxu1 %v6510_v7 }
0x13a4   : > { %5754 = vmatmul.mubr.msk.f32.vlgmr.msra.gmra.mrb[32].mxu1 %vm434_vm0, %v6490_v1  ;;  %v2764_v1 = vmul.f32 %v6555_v20, %v6884_v62 }
0x13a5   : > { %6119 = vmatpush3.bf16.msra.mxu1 %v6510_v7 }
0x13a6   : > { %6121 = vmatprep.subr.bf16.mxu1 %v6512_v8 }
0x13a9   : > { %6123 = vmatpush3.bf16.msra.mxu1 %v6512_v8 }
0x1477   : > { %v5755_v32 = vpop.f32.mrb[32].mxu1 }
0x1478   : > { %v2831_v33 = vpop.f32.mrb[33].mxu1 }
0x1479   : > { %5764 = vmatprep.mubr.msk.f32.mxu1 %vm631_vm1, %v2831_v33 }
0x147a   : > { %5765 = vmatmul.mubr.msk.f32.vlgmr.msra.gmra.mrb[34].mxu1 %vm631_vm1, %v5755_v32 }
0x147b   : > { %5781 = vmatprep.mubr.msk.f32.mxu1 %vm434_vm0, %v6539_v17 }
0x154d   : > { %v5766_v2 = vpop.f32.mrb[34].mxu1 }
0x154e   : > { %v2922_v3 = vadd.f32 %v5766_v2, %v2764_v1  ;;  %v2912_v6 = vpop.f32.mrb[35].mxu1 }
0x154f   : > { %v2921_v38 = vadd.f32 %v2912_v6, %v2763_v63 }
0x1550   : > { %v2924_v39 = vadd.f32 %v6566_v24, %v2922_v3 }
0x1551   : > { %v2923_v12 = vadd.f32 %v6566_v24, %v2921_v38  ;;  %v6912_v24 = vld [vmem:[%s7230_s1] sm:$0xff] }
0x1552   : > { %v5181_v14 = vmul.f32 -1.442695, %v2924_v39  ;;  %v6968_v38 = vld [vmem:[%s7232_s3] sm:$0xff] }
0x1553   : > { %v5180_v17 = vmul.f32 -1.442695, %v2923_v12 }
0x1554   : > { %6329 = vpow2.f32 %v5181_v14  ;;  %v6979_v14 = vld [vmem:[%s7233_s4] ss:$0 sm:$0xff] }
0x1555   : > { %6331 = vpow2.f32 %v5180_v17 }
0x155e   : > { %v6330_v22 = vpop.eup %6329 }
0x155f   : > { %v6332_v23 = vpop.eup %6331  ;;  %v2932_v25 = vadd.f32 1.0, %v6330_v22 }
0x1560   : > { %v2931_v26 = vadd.f32 1.0, %v6332_v23 }
0x1561   : > { %6333 = vrcp.f32 %v2932_v25 }
0x1562   : > { %6335 = vrcp.f32 %v2931_v26 }
0x156b   : > { %v6334_v27 = vpop.eup %6333 }
0x156c   : > { %v6336_v20 = vpop.eup %6335 }
0x156d   : > { %v6124_v28 = vpack.c.bf16 %v6334_v27, %v6336_v20  ;;  %v6988_v20 = vld [vmem:[%s7235_s6] ss:$0 sm:$0xff] }
0x156f   : > { %6125 = vmatprep.subr.bf16.mxu0 %v6124_v28  ;;  %6129 = vmatprep.subr.bf16.mxu1 %v6124_v28 }
0x1570   : > { %6127 = vmatpush3.bf16.msra.mxu0 %v6124_v28  ;;  %6131 = vmatpush3.bf16.msra.mxu1 %v6124_v28 }
0x1571   : > { %6137 = vmatprep.subr.bf16.mxu1 %v6626_v55 }
0x1573   : > { %5782 = vmatmul.mubr.msk.f32.vlgmr.msra.gmra.mrb[36].mxu1 %vm434_vm0, %v6573_v40  ;;  %5772 = vmatmul.mubr.msk.f32.vlgmr.msra.gmra.mrb[34].mxu0 %vm434_vm0, %v6578_v41  ;;  %v6406_v40 = vmov 5  }
0x1574   : > { %5784 = vmatprep.mubr.msk.f32.mxu1 %vm434_vm0, %v6583_v42  ;;  %5774 = vmatprep.mubr.msk.f32.mxu0 %vm434_vm0, %v6601_v45 }
0x1575   : > { %6139 = vmatpush3.bf16.msra.mxu1 %v6626_v55  ;;  %6275 = vset.pattern.permute.xlu0 %v6406_v40 }
0x1576   : > { %6141 = vmatprep.subr.bf16.mxu1 %v6634_v58  ;;  %6276 = vset.pattern.permute.xlu1 %v6406_v40 }
0x1577   : > { %5785 = vmatmul.mubr.msk.f32.gmra.mrb[38].mxu1 %vm434_vm0, %v6594_v43  ;;  %5775 = vmatmul.mubr.msk.f32.gmra.mrb[36].mxu0 %vm434_vm0, %v6608_v46 }
0x1578   : > { %5791 = vmatprep.mubr.msk.f32.mxu0 %vm434_vm0, %v6912_v24 }
0x1579   : > { %6143 = vmatpush3.bf16.msra.mxu1 %v6634_v58 }
0x1646   : > { %v5783_v41 = vpop.f32.mrb[36].mxu1  ;;  %v5773_v42 = vpop.f32.mrb[34].mxu0 }
0x1647   : > { %v3088_v45 = vpop.f32.mrb[37].mxu1  ;;  %v3003_v43 = vpop.f32.mrb[35].mxu0 }
0x1648   : > { %3111 = vrot.lane.b32.xlu1 %v3088_v45, %s6402_s28 }
0x164a   : > { %v5786_v46 = vpop.f32.mrb[38].mxu1  ;;  %v5776_v21 = vpop.f32.mrb[36].mxu0 }
0x164b   : > { %v3098_v9 = vpop.f32.mrb[39].mxu1  ;;  %v3013_v29 = vpop.f32.mrb[37].mxu0 }
0x164c   : > { %3113 = vrot.lane.b32.xlu1 %v5783_v41, %s6402_s28  ;;  %3115 = vrot.lane.b32.xlu0 %v3098_v9, %s6402_s28 }
0x1650   : > { %3117 = vrot.lane.b32.xlu1 %v5786_v46, %s6402_s28  ;;  %3302 = vperm.xlu0 %6275, %v6532_v16  }
0x1654   : > { %3306 = vperm.xlu1 %6276, %v6530_v15  }
0x16ba   : > { %v3112_v11 = vpop.permute.xlu1 %3111 }
0x16bb   : > { %v3123_v30 = vadd.f32 %v3112_v11, %v3003_v43 }
0x16bd   : > { %v3129_v34 = vmul.f32 %v3123_v30, %v6870_v61  ;;  %v6996_v30 = vld [vmem:[%s7232_s3 + $0x8] sm:$0xff] }
0x16be   : > { %v3114_v19 = vpop.permute.xlu1 %3113  ;;  %v3116_v57 = vpop.permute.xlu0 %3115 }
0x16bf   : > { %v3124_v31 = vadd.f32 %v5773_v42, %v3114_v19  ;;  %v3125_v49 = vadd.f32 %v3116_v57, %v3013_v29  ;;  %v7003_v19 = vld [vmem:[%s7231_s2 + $0x8] sm:$0xff] }
0x16c1   : > { %v3130_v4 = vmul.f32 %v3124_v31, %v6868_v60  ;;  %v3295_v62 = vsub.f32 1.0, %v3125_v49  ;;  %v3293_v63 = vmul.f32 %v3125_v49, %v6870_v61  ;;  %v7010_v31 = vld [vmem:[%s7232_s3 + $0x10] sm:$0xff] }
0x16c2   : > { %v3118_v56 = vpop.permute.xlu1 %3117 }
0x16c3   : > { %v6132_v5 = vpack.c.bf16 %v3130_v4, %v3129_v34  ;;  %v3126_v59 = vadd.f32 %v5776_v21, %v3118_v56  ;;  %v7017_v34 = vld [vmem:[%s7231_s2 + $0x10] sm:$0xff]  ;;  %v7026_v4 = vld [vmem:[%s7232_s3 + $0x18] sm:$0xff] }
0x16c5   : > { %6133 = vmatprep.subr.bf16.mxu0 %v6132_v5  ;;  %v3296_v32 = vsub.f32 1.0, %v3126_v59  ;;  %v3294_v10 = vmul.f32 %v3126_v59, %v6868_v60 }
0x16c6   : > { %6135 = vmatpush3.bf16.msra.mxu0 %v6132_v5  ;;  %v7033_v5 = vld [vmem:[%s7231_s2 + $0x18] sm:$0xff] }
0x16c9   : > { %5792 = vmatmul.mubr.msk.f32.vlgmr.msra.gmra.mrb[38].mxu0 %vm434_vm0, %v6928_v37 }
0x16ca   : > { %5809 = vmatprep.mubr.msk.f32.mxu0 %vm434_vm0, %v6912_v24 }
0x16cf   : > { %v6974_v12 = vpop.permute.xlu0 %3302 }
0x16d0   : > { %v3309_v22 = vmul.f32 %v6979_v14, %v6974_v12 }
0x16d3   : > { %v6972_v39 = vpop.permute.xlu1 %3306 }
0x16d4   : > { %v3310_v17 = vmul.f32 %v6979_v14, %v6972_v39 }
0x179c   : > { %v5793_v0 = vpop.f32.mrb[38].mxu0 }
0x179d   : > { %v3197_v44 = vpop.f32.mrb[39].mxu0 }
0x179e   : > { %5802 = vmatprep.mubr.msk.f32.mxu1 %vm631_vm1, %v3197_v44 }
0x179f   : > { %5803 = vmatmul.mubr.msk.f32.vlgmr.msra.gmra.mrb[40].mxu1 %vm631_vm1, %v5793_v0  ;;  %v6407_v0 = vmov 6  }
0x17a0   : > { %5827 = vmatprep.mubr.msk.f32.mxu1 %vm434_vm0, %v6939_v47  ;;  %6278 = vset.pattern.permute.xlu0 %v6407_v0 }
0x17a1   : > { %6277 = vset.pattern.permute.xlu1 %v6407_v0 }
0x1872   : > { %v5804_v18 = vpop.f32.mrb[40].mxu1 }
0x1873   : > { %v3288_v52 = vadd.f32 %v5804_v18, %v3128_v48  ;;  %v3278_v53 = vpop.f32.mrb[41].mxu1 }
0x1874   : > { %v3287_v35 = vadd.f32 %v3278_v53, %v3127_v51 }
0x1875   : > { %v3290_v54 = vadd.f32 %v6660_v13, %v3288_v52 }
0x1876   : > { %v3289_v36 = vadd.f32 %v6660_v13, %v3287_v35 }
0x1877   : > { %6337 = vtanh.f32 %v3290_v54 }
0x1878   : > { %6339 = vtanh.f32 %v3289_v36 }
0x1881   : > { %v6338_v33 = vpop.eup %6337 }
0x1882   : > { %v6340_v1 = vpop.eup %6339  ;;  %v3298_v50 = vmul.f32 %v6338_v33, %v3296_v32 }
0x1883   : > { %v3297_v2 = vmul.f32 %v6340_v1, %v3295_v62 }
0x1884   : > { %v6951_v3 = vadd.f32 %v3298_v50, %v3294_v10  ;;  %v7059_v10 = vld [vmem:[%s7236_s7] ss:$0 sm:$0xff] }
0x1885   : > { %v6953_v6 = vadd.f32 %v3297_v2, %v3293_v63  ;;  %v3674_v50 = vmul.f32 %v7059_v10, %v6972_v39  ;;  %v3673_v63 = vmul.f32 %v7059_v10, %v6974_v12 }
0x1887   : > { %v6144_v13 = vpack.c.bf16 %v6951_v3, %v6953_v6 }
0x1889   : > { %6145 = vmatprep.subr.bf16.mxu0 %v6144_v13 }
0x188a   : > { %6147 = vmatpush3.bf16.msra.mxu0 %v6144_v13 }
0x188b   : > { %6149 = vmatprep.subr.bf16.mxu0 %v6510_v7 }
0x188d   : > { %5810 = vmatmul.mubr.msk.f32.vlgmr.msra.gmra.mrb[40].mxu0 %vm434_vm0, %v6928_v37 }
0x188e   : > { %6151 = vmatpush3.bf16.msra.mxu0 %v6510_v7 }
0x188f   : > { %6153 = vmatprep.subr.bf16.mxu0 %v6512_v8 }
0x1892   : > { %6155 = vmatpush3.bf16.msra.mxu0 %v6512_v8 }
0x1960   : > { %v5811_v60 = vpop.f32.mrb[40].mxu0 }
0x1961   : > { %v3377_v61 = vpop.f32.mrb[41].mxu0 }
0x1962   : > { %5820 = vmatprep.mubr.msk.f32.mxu0 %vm631_vm1, %v3377_v61 }
0x1963   : > { %5821 = vmatmul.mubr.msk.f32.vlgmr.msra.gmra.mrb[42].mxu0 %vm631_vm1, %v5811_v60 }
0x1964   : > { %5837 = vmatprep.mubr.msk.f32.mxu0 %vm434_vm0, %v6968_v38 }
0x1a36   : > { %v5822_v23 = vpop.f32.mrb[42].mxu0 }
0x1a37   : > { %v3468_v25 = vadd.f32 %v5822_v23, %v3310_v17  ;;  %v3458_v26 = vpop.f32.mrb[43].mxu0  ;;  %v7068_v17 = vld [vmem:[%s7238_s9] ss:$0 sm:$0xff] }
0x1a38   : > { %v3467_v27 = vadd.f32 %v3458_v26, %v3309_v22 }
0x1a39   : > { %v3470_v28 = vadd.f32 %v6988_v20, %v3468_v25 }
0x1a3a   : > { %v3469_v40 = vadd.f32 %v6988_v20, %v3467_v27 }
0x1a3b   : > { %v5199_v41 = vmul.f32 -1.442695, %v3470_v28 }
0x1a3c   : > { %v5198_v42 = vmul.f32 -1.442695, %v3469_v40 }
0x1a3d   : > { %6341 = vpow2.f32 %v5199_v41 }
0x1a3e   : > { %6343 = vpow2.f32 %v5198_v42 }
0x1a47   : > { %v6342_v45 = vpop.eup %6341 }
0x1a48   : > { %v6344_v43 = vpop.eup %6343  ;;  %v3478_v46 = vadd.f32 1.0, %v6342_v45 }
0x1a49   : > { %v3477_v21 = vadd.f32 1.0, %v6344_v43 }
0x1a4a   : > { %6345 = vrcp.f32 %v3478_v46 }
0x1a4b   : > { %6347 = vrcp.f32 %v3477_v21 }
0x1a54   : > { %v6346_v9 = vpop.eup %6345 }
0x1a55   : > { %v6348_v29 = vpop.eup %6347 }
0x1a56   : > { %v6156_v11 = vpack.c.bf16 %v6346_v9, %v6348_v29 }
0x1a58   : > { %6157 = vmatprep.subr.bf16.mxu1 %v6156_v11  ;;  %6161 = vmatprep.subr.bf16.mxu0 %v6156_v11 }
0x1a59   : > { %6159 = vmatpush3.bf16.msra.mxu1 %v6156_v11  ;;  %6163 = vmatpush3.bf16.msra.mxu0 %v6156_v11 }
0x1a5a   : > { %6169 = vmatprep.subr.bf16.mxu0 %v6626_v55 }
0x1a5c   : > { %5838 = vmatmul.mubr.msk.f32.vlgmr.msra.gmra.mrb[44].mxu0 %vm434_vm0, %v6996_v30  ;;  %5828 = vmatmul.mubr.msk.f32.vlgmr.msra.gmra.mrb[42].mxu1 %vm434_vm0, %v7003_v19 }
0x1a5d   : > { %5840 = vmatprep.mubr.msk.f32.mxu0 %vm434_vm0, %v7010_v31  ;;  %5830 = vmatprep.mubr.msk.f32.mxu1 %vm434_vm0, %v7017_v34 }
0x1a5e   : > { %6171 = vmatpush3.bf16.msra.mxu0 %v6626_v55 }
0x1a5f   : > { %6173 = vmatprep.subr.bf16.mxu0 %v6634_v58 }
0x1a60   : > { %5841 = vmatmul.mubr.msk.f32.gmra.mrb[46].mxu0 %vm434_vm0, %v7026_v4  ;;  %5831 = vmatmul.mubr.msk.f32.gmra.mrb[44].mxu1 %vm434_vm0, %v7033_v5 }
0x1a61   : > { %5847 = vmatprep.mubr.msk.f32.mxu1 %vm434_vm0, %v6912_v24 }
0x1a62   : > { %6175 = vmatpush3.bf16.msra.mxu0 %v6634_v58 }
0x1b2f   : > { %v5839_v44 = vpop.f32.mrb[44].mxu0  ;;  %v5829_v48 = vpop.f32.mrb[42].mxu1 }
0x1b30   : > { %3659 = vrot.lane.b32.xlu0 %v5839_v44, %s6402_s28  ;;  %v3634_v51 = vpop.f32.mrb[45].mxu0  ;;  %v3549_v18 = vpop.f32.mrb[43].mxu1 }
0x1b31   : > { %3657 = vrot.lane.b32.xlu1 %v3634_v51, %s6402_s28 }
0x1b33   : > { %v5842_v52 = vpop.f32.mrb[46].mxu0  ;;  %v5832_v53 = vpop.f32.mrb[44].mxu1 }
0x1b34   : > { %3663 = vrot.lane.b32.xlu0 %v5842_v52, %s6402_s28  ;;  %v3644_v35 = vpop.f32.mrb[47].mxu0  ;;  %v3559_v54 = vpop.f32.mrb[45].mxu1 }
0x1b35   : > { %3661 = vrot.lane.b32.xlu1 %v3644_v35, %s6402_s28 }
0x1b38   : > { %3852 = vperm.xlu0 %6278, %v6530_v15  }
0x1b39   : > { %3848 = vperm.xlu1 %6277, %v6532_v16  }
0x1ba2   : > { %v3660_v36 = vpop.permute.xlu0 %3659 }
0x1ba3   : > { %v3670_v56 = vadd.f32 %v5829_v48, %v3660_v36  ;;  %v3658_v57 = vpop.permute.xlu1 %3657 }
0x1ba4   : > { %v3669_v59 = vadd.f32 %v3658_v57, %v3549_v18 }
0x1ba5   : > { %v3676_v49 = vmul.f32 %v3670_v56, %v6951_v3 }
0x1ba6   : > { %v3675_v32 = vmul.f32 %v3669_v59, %v6953_v6  ;;  %v3664_v25 = vpop.permute.xlu0 %3663 }
0x1ba7   : > { %v3662_v39 = vpop.permute.xlu1 %3661  ;;  %v3672_v26 = vadd.f32 %v5832_v53, %v3664_v25 }
0x1ba8   : > { %v6164_v33 = vpack.c.bf16 %v3676_v49, %v3675_v32  ;;  %v3671_v27 = vadd.f32 %v3662_v39, %v3559_v54 }
0x1ba9   : > { %v3842_v12 = vsub.f32 1.0, %v3672_v26  ;;  %v3840_v42 = vmul.f32 %v3672_v26, %v6951_v3 }
0x1baa   : > { %6165 = vmatprep.subr.bf16.mxu1 %v6164_v33  ;;  %v3841_v40 = vsub.f32 1.0, %v3671_v27  ;;  %v3839_v43 = vmul.f32 %v3671_v27, %v6953_v6 }
0x1bab   : > { %6167 = vmatpush3.bf16.msra.mxu1 %v6164_v33 }
0x1bae   : > { %5848 = vmatmul.mubr.msk.f32.vlgmr.msra.gmra.mrb[46].mxu1 %vm434_vm0, %v6928_v37 }
0x1baf   : > { %5865 = vmatprep.mubr.msk.f32.mxu1 %vm434_vm0, %v6912_v24 }
0x1bb7   : > { %v7090_v11 = vpop.permute.xlu0 %3852 }
0x1bb8   : > { %v7092_v0 = vpop.permute.xlu1 %3848  ;;  %v3856_v44 = vmul.f32 %v6979_v14, %v7090_v11 }
0x1bb9   : > { %v3855_v48 = vmul.f32 %v6979_v14, %v7092_v0 }
0x1c81   : > { %v5849_v62 = vpop.f32.mrb[46].mxu1 }
0x1c82   : > { %v3743_v1 = vpop.f32.mrb[47].mxu1 }
0x1c83   : > { %5858 = vmatprep.mubr.msk.f32.mxu0 %vm631_vm1, %v3743_v1 }
0x1c84   : > { %5859 = vmatmul.mubr.msk.f32.vlgmr.msra.gmra.mrb[48].mxu0 %vm631_vm1, %v5849_v62 }
0x1c85   : > { %5883 = vmatprep.mubr.msk.f32.mxu0 %vm434_vm0, %v6939_v47 }
0x1d57   : > { %v5860_v2 = vpop.f32.mrb[48].mxu0 }
0x1d58   : > { %v3834_v13 = vadd.f32 %v5860_v2, %v3674_v50  ;;  %v3824_v60 = vpop.f32.mrb[49].mxu0  ;;  %v6408_v50 = vmov 7  }
0x1d59   : > { %v3833_v61 = vadd.f32 %v3824_v60, %v3673_v63  ;;  %6279 = vset.pattern.permute.xlu0 %v6408_v50  ;;  %6280 = vset.pattern.permute.xlu1 %v6408_v50 }
0x1d5a   : > { %v3836_v22 = vadd.f32 %v7068_v17, %v3834_v13 }
0x1d5b   : > { %v3835_v23 = vadd.f32 %v7068_v17, %v3833_v61 }
0x1d5c   : > { %6349 = vtanh.f32 %v3836_v22 }
0x1d5d   : > { %6351 = vtanh.f32 %v3835_v23 }
0x1d66   : > { %v6350_v28 = vpop.eup %6349 }
0x1d67   : > { %v6352_v41 = vpop.eup %6351  ;;  %v3844_v45 = vmul.f32 %v6350_v28, %v3842_v12 }
0x1d68   : > { %v3843_v46 = vmul.f32 %v6352_v41, %v3841_v40 }
0x1d69   : > { %v7074_v21 = vadd.f32 %v3844_v45, %v3840_v42  ;;  %v4219_v45 = vmul.f32 %v7059_v10, %v7092_v0 }
0x1d6a   : > { %v7076_v9 = vadd.f32 %v3843_v46, %v3839_v43 }
0x1d6c   : > { %v6176_v29 = vpack.c.bf16 %v7074_v21, %v7076_v9 }
0x1d6e   : > { %6177 = vmatprep.subr.bf16.mxu1 %v6176_v29 }
0x1d6f   : > { %6179 = vmatpush3.bf16.msra.mxu1 %v6176_v29 }
0x1d70   : > { %6181 = vmatprep.subr.bf16.mxu1 %v6510_v7 }
0x1d72   : > { %5866 = vmatmul.mubr.msk.f32.vlgmr.msra.gmra.mrb[48].mxu1 %vm434_vm0, %v6928_v37 }
0x1d73   : > { %6183 = vmatpush3.bf16.msra.mxu1 %v6510_v7 }
0x1d74   : > { %6185 = vmatprep.subr.bf16.mxu1 %v6512_v8 }
0x1d77   : > { %6187 = vmatpush3.bf16.msra.mxu1 %v6512_v8 }
0x1e45   : > { %v5867_v3 = vpop.f32.mrb[48].mxu1 }
0x1e46   : > { %v3923_v6 = vpop.f32.mrb[49].mxu1 }
0x1e47   : > { %5876 = vmatprep.mubr.msk.f32.mxu1 %vm631_vm1, %v3923_v6 }
0x1e48   : > { %5877 = vmatmul.mubr.msk.f32.vlgmr.msra.gmra.mrb[50].mxu1 %vm631_vm1, %v5867_v3 }
0x1e49   : > { %5893 = vmatprep.mubr.msk.f32.mxu1 %vm434_vm0, %v6968_v38 }
0x1f1b   : > { %v5878_v51 = vpop.f32.mrb[50].mxu1 }
0x1f1c   : > { %v4014_v18 = vadd.f32 %v5878_v51, %v3856_v44  ;;  %v4004_v52 = vpop.f32.mrb[51].mxu1 }
0x1f1d   : > { %v4013_v53 = vadd.f32 %v4004_v52, %v3855_v48 }
0x1f1e   : > { %v4016_v35 = vadd.f32 %v6988_v20, %v4014_v18 }
0x1f1f   : > { %v4015_v54 = vadd.f32 %v6988_v20, %v4013_v53 }
0x1f20   : > { %v5217_v36 = vmul.f32 -1.442695, %v4016_v35 }
0x1f21   : > { %v5216_v56 = vmul.f32 -1.442695, %v4015_v54 }
0x1f22   : > { %6353 = vpow2.f32 %v5217_v36 }
0x1f23   : > { %6355 = vpow2.f32 %v5216_v56 }
0x1f2c   : > { %v6354_v57 = vpop.eup %6353 }
0x1f2d   : > { %v6356_v59 = vpop.eup %6355  ;;  %v4024_v49 = vadd.f32 1.0, %v6354_v57 }
0x1f2e   : > { %v4023_v32 = vadd.f32 1.0, %v6356_v59 }
0x1f2f   : > { %6357 = vrcp.f32 %v4024_v49 }
0x1f30   : > { %6359 = vrcp.f32 %v4023_v32 }
0x1f39   : > { %v6358_v33 = vpop.eup %6357 }
0x1f3a   : > { %v6360_v62 = vpop.eup %6359 }
0x1f3b   : > { %v6188_v1 = vpack.c.bf16 %v6358_v33, %v6360_v62 }
0x1f3d   : > { %6189 = vmatprep.subr.bf16.mxu0 %v6188_v1  ;;  %6193 = vmatprep.subr.bf16.mxu1 %v6188_v1 }
0x1f3e   : > { %6191 = vmatpush3.bf16.msra.mxu0 %v6188_v1  ;;  %6195 = vmatpush3.bf16.msra.mxu1 %v6188_v1 }
0x1f3f   : > { %6201 = vmatprep.subr.bf16.mxu1 %v6626_v55 }
0x1f41   : > { %5894 = vmatmul.mubr.msk.f32.vlgmr.msra.gmra.mrb[52].mxu1 %vm434_vm0, %v6996_v30  ;;  %5884 = vmatmul.mubr.msk.f32.vlgmr.msra.gmra.mrb[50].mxu0 %vm434_vm0, %v7003_v19 }
0x1f42   : > { %5896 = vmatprep.mubr.msk.f32.mxu1 %vm434_vm0, %v7010_v31  ;;  %5886 = vmatprep.mubr.msk.f32.mxu0 %vm434_vm0, %v7017_v34 }
0x1f43   : > { %6203 = vmatpush3.bf16.msra.mxu1 %v6626_v55 }
0x1f44   : > { %6205 = vmatprep.subr.bf16.mxu1 %v6634_v58 }
0x1f45   : > { %5897 = vmatmul.mubr.msk.f32.gmra.mrb[54].mxu1 %vm434_vm0, %v7026_v4  ;;  %5887 = vmatmul.mubr.msk.f32.gmra.mrb[52].mxu0 %vm434_vm0, %v7033_v5 }
0x1f46   : > { %5903 = vmatprep.mubr.msk.f32.mxu0 %vm434_vm0, %v6912_v24 }
0x1f47   : > { %6207 = vmatpush3.bf16.msra.mxu1 %v6634_v58 }
0x2014   : > { %v5895_v63 = vpop.f32.mrb[52].mxu1  ;;  %v5885_v2 = vpop.f32.mrb[50].mxu0 }
0x2015   : > { %v4180_v13 = vpop.f32.mrb[53].mxu1  ;;  %v4095_v60 = vpop.f32.mrb[51].mxu0 }
0x2016   : > { %4203 = vrot.lane.b32.xlu1 %v4180_v13, %s6402_s28 }
0x2018   : > { %v5898_v61 = vpop.f32.mrb[54].mxu1  ;;  %v5888_v22 = vpop.f32.mrb[52].mxu0 }
0x2019   : > { %v4190_v23 = vpop.f32.mrb[55].mxu1  ;;  %v4105_v25 = vpop.f32.mrb[53].mxu0 }
0x201a   : > { %4205 = vrot.lane.b32.xlu1 %v5895_v63, %s6402_s28  ;;  %4207 = vrot.lane.b32.xlu0 %v4190_v23, %s6402_s28 }
0x201e   : > { %4209 = vrot.lane.b32.xlu1 %v5898_v61, %s6402_s28  ;;  %4394 = vperm.xlu0 %6279, %v6532_v16  }
0x2022   : > { %4398 = vperm.xlu1 %6280, %v6530_v15   ;;  %v4220_v15 = vmul.f32 %v7059_v10, %v7090_v11 }
0x2088   : > { %v4204_v39 = vpop.permute.xlu1 %4203 }
0x2089   : > { %v4215_v26 = vadd.f32 %v4204_v39, %v4095_v60 }
0x208b   : > { %v4221_v28 = vmul.f32 %v4215_v26, %v7076_v9 }
0x208c   : > { %v4206_v27 = vpop.permute.xlu1 %4205  ;;  %v4208_v51 = vpop.permute.xlu0 %4207 }
0x208d   : > { %v4216_v12 = vadd.f32 %v5885_v2, %v4206_v27 }
0x208f   : > { %v4222_v40 = vmul.f32 %v4216_v12, %v7074_v21 }
0x2090   : > { %v4210_v48 = vpop.permute.xlu1 %4209 }
0x2091   : > { %v6196_v41 = vpack.c.bf16 %v4222_v40, %v4221_v28  ;;  %v4218_v18 = vadd.f32 %v5888_v22, %v4210_v48 }
0x2093   : > { %6197 = vmatprep.subr.bf16.mxu0 %v6196_v41  ;;  %v4388_v52 = vsub.f32 1.0, %v4218_v18  ;;  %v4386_v0 = vmul.f32 %v4218_v18, %v7074_v21 }
0x2094   : > { %6199 = vmatpush3.bf16.msra.mxu0 %v6196_v41 }
0x2097   : > { %5904 = vmatmul.mubr.msk.f32.vlgmr.msra.gmra.mrb[54].mxu0 %vm434_vm0, %v6928_v37 }
0x2098   : > { %5921 = vmatprep.mubr.msk.f32.mxu0 %vm434_vm0, %v6912_v24 }
0x209d   : > { %v7160_v33 = vpop.permute.xlu0 %4394 }
0x209e   : > { %v4401_v62 = vmul.f32 %v6979_v14, %v7160_v33 }
0x20a1   : > { %v7158_v32 = vpop.permute.xlu1 %4398 }
0x216a   : > { %v5905_v16 = vpop.f32.mrb[54].mxu0 }
0x216b   : > { %v4289_v42 = vpop.f32.mrb[55].mxu0 }
0x216c   : > { %5914 = vmatprep.mubr.msk.f32.mxu1 %vm631_vm1, %v4289_v42 }
0x216d   : > { %5915 = vmatmul.mubr.msk.f32.vlgmr.msra.gmra.mrb[56].mxu1 %vm631_vm1, %v5905_v16 }
0x216e   : > { %5939 = vmatprep.mubr.msk.f32.mxu1 %vm434_vm0, %v6939_v47  ;;  %v4217_v47 = vadd.f32 %v4208_v51, %v4105_v25 }
0x2170   : > { %v4387_v11 = vsub.f32 1.0, %v4217_v47  ;;  %v4385_v36 = vmul.f32 %v4217_v47, %v7076_v9 }
0x2240   : > { %v5916_v43 = vpop.f32.mrb[56].mxu1 }
0x2241   : > { %v4380_v46 = vadd.f32 %v5916_v43, %v4220_v15  ;;  %v4370_v29 = vpop.f32.mrb[57].mxu1  ;;  %v4939_v15 = vld [vmem:[%s7239_s10] sm:$0xff]  ;;  %v4941_v43 = vld [vmem:[%s7239_s10 + $0x10] sm:$0xff] }
0x2242   : > { %v4379_v3 = vadd.f32 %v4370_v29, %v4219_v45  ;;  %v4940_v45 = vld [vmem:[%s7239_s10 + $0x8] sm:$0xff] }
0x2243   : > { %v4382_v6 = vadd.f32 %v7068_v17, %v4380_v46  ;;  %v6240_v46 = vpack.c.bf16 %v4940_v45, %v4939_v15 }
0x2244   : > { %v4381_v44 = vadd.f32 %v7068_v17, %v4379_v3  ;;  %v4766_v3 = vmul.f32 %v7059_v10, %v7158_v32 }
0x2245   : > { %6361 = vtanh.f32 %v4382_v6  ;;  %v4765_v6 = vmul.f32 %v7059_v10, %v7160_v33 }
0x2246   : > { %6363 = vtanh.f32 %v4381_v44 }
0x224f   : > { %v6362_v53 = vpop.eup %6361 }
0x2250   : > { %v6364_v35 = vpop.eup %6363  ;;  %v4390_v54 = vmul.f32 %v6362_v53, %v4388_v52 }
0x2251   : > { %v4389_v56 = vmul.f32 %v6364_v35, %v4387_v11 }
0x2252   : > { %v7142_v57 = vadd.f32 %v4390_v54, %v4386_v0 }
0x2253   : > { %v7144_v59 = vadd.f32 %v4389_v56, %v4385_v36 }
0x2255   : > { %v6208_v49 = vpack.c.bf16 %v7142_v57, %v7144_v59 }
0x2257   : > { %6209 = vmatprep.subr.bf16.mxu0 %v6208_v49 }
0x2258   : > { %6211 = vmatpush3.bf16.msra.mxu0 %v6208_v49 }
0x2259   : > { %6213 = vmatprep.subr.bf16.mxu0 %v6510_v7 }
0x225b   : > { %5922 = vmatmul.mubr.msk.f32.vlgmr.msra.gmra.mrb[56].mxu0 %vm434_vm0, %v6928_v37 }
0x225c   : > { %6215 = vmatpush3.bf16.msra.mxu0 %v6510_v7  ;;  %v4402_v7 = vmul.f32 %v6979_v14, %v7158_v32 }
0x225d   : > { %6217 = vmatprep.subr.bf16.mxu0 %v6512_v8 }
0x2260   : > { %6219 = vmatpush3.bf16.msra.mxu0 %v6512_v8 }
0x232e   : > { %v5923_v21 = vpop.f32.mrb[56].mxu0 }
0x232f   : > { %v4469_v9 = vpop.f32.mrb[57].mxu0 }
0x2330   : > { %5932 = vmatprep.mubr.msk.f32.mxu0 %vm631_vm1, %v4469_v9 }
0x2331   : > { %5933 = vmatmul.mubr.msk.f32.vlgmr.msra.gmra.mrb[58].mxu0 %vm631_vm1, %v5923_v21 }
0x2332   : > { %5949 = vmatprep.mubr.msk.f32.mxu0 %vm434_vm0, %v6968_v38 }
0x2404   : > { %v5934_v8 = vpop.f32.mrb[58].mxu0 }
0x2405   : > { %v4560_v1 = vadd.f32 %v5934_v8, %v4402_v7  ;;  %v4550_v50 = vpop.f32.mrb[59].mxu0 }
0x2406   : > { %v4559_v63 = vadd.f32 %v4550_v50, %v4401_v62 }
0x2407   : > { %v4562_v2 = vadd.f32 %v6988_v20, %v4560_v1 }
0x2408   : > { %v4561_v13 = vadd.f32 %v6988_v20, %v4559_v63 }
0x2409   : > { %v5235_v60 = vmul.f32 -1.442695, %v4562_v2 }
0x240a   : > { %v5234_v38 = vmul.f32 -1.442695, %v4561_v13 }
0x240b   : > { %6365 = vpow2.f32 %v5235_v60 }
0x240c   : > { %6367 = vpow2.f32 %v5234_v38 }
0x2415   : > { %v6366_v61 = vpop.eup %6365 }
0x2416   : > { %v6368_v22 = vpop.eup %6367  ;;  %v4570_v23 = vadd.f32 1.0, %v6366_v61 }
0x2417   : > { %v4569_v25 = vadd.f32 1.0, %v6368_v22 }
0x2418   : > { %6369 = vrcp.f32 %v4570_v23 }
0x2419   : > { %6371 = vrcp.f32 %v4569_v25 }
0x2422   : > { %v6370_v39 = vpop.eup %6369 }
0x2423   : > { %v6372_v14 = vpop.eup %6371 }
0x2424   : > { %v6220_v26 = vpack.c.bf16 %v6370_v39, %v6372_v14 }
0x2426   : > { %6221 = vmatprep.subr.bf16.mxu1 %v6220_v26  ;;  %6225 = vmatprep.subr.bf16.mxu0 %v6220_v26 }
0x2427   : > { %6223 = vmatpush3.bf16.msra.mxu1 %v6220_v26  ;;  %6227 = vmatpush3.bf16.msra.mxu0 %v6220_v26 }
0x2428   : > { %6233 = vmatprep.subr.bf16.mxu0 %v6626_v55 }
0x242a   : > { %5950 = vmatmul.mubr.msk.f32.vlgmr.msra.gmra.mrb[60].mxu0 %vm434_vm0, %v6996_v30  ;;  %5940 = vmatmul.mubr.msk.f32.vlgmr.msra.gmra.mrb[58].mxu1 %vm434_vm0, %v7003_v19 }
0x242b   : > { %5952 = vmatprep.mubr.msk.f32.mxu0 %vm434_vm0, %v7010_v31  ;;  %5942 = vmatprep.mubr.msk.f32.mxu1 %vm434_vm0, %v7017_v34 }
0x242c   : > { %6235 = vmatpush3.bf16.msra.mxu0 %v6626_v55 }
0x242d   : > { %6237 = vmatprep.subr.bf16.mxu0 %v6634_v58 }
0x242e   : > { %5953 = vmatmul.mubr.msk.f32.gmra.mrb[62].mxu0 %vm434_vm0, %v7026_v4  ;;  %5943 = vmatmul.mubr.msk.f32.gmra.mrb[60].mxu1 %vm434_vm0, %v7033_v5 }
0x242f   : > { %5959 = vmatprep.mubr.msk.f32.mxu1 %vm434_vm0, %v6912_v24 }
0x2430   : > { %6239 = vmatpush3.bf16.msra.mxu0 %v6634_v58 }
0x24fd   : > { %v5951_v20 = vpop.f32.mrb[60].mxu0  ;;  %v5941_v30 = vpop.f32.mrb[58].mxu1 }
0x24fe   : > { %4751 = vrot.lane.b32.xlu0 %v5951_v20, %s6402_s28  ;;  %v4726_v19 = vpop.f32.mrb[61].mxu0  ;;  %v4641_v31 = vpop.f32.mrb[59].mxu1 }
0x24ff   : > { %4749 = vrot.lane.b32.xlu1 %v4726_v19, %s6402_s28 }
0x2501   : > { %v5954_v55 = vpop.f32.mrb[62].mxu0  ;;  %v5944_v34 = vpop.f32.mrb[60].mxu1 }
0x2502   : > { %4755 = vrot.lane.b32.xlu0 %v5954_v55, %s6402_s28  ;;  %v4736_v4 = vpop.f32.mrb[63].mxu0  ;;  %v4651_v27 = vpop.f32.mrb[61].mxu1 }
0x2503   : > { %4753 = vrot.lane.b32.xlu1 %v4736_v4, %s6402_s28 }
0x2570   : > { %v4752_v5 = vpop.permute.xlu0 %4751 }
0x2571   : > { %v4762_v24 = vadd.f32 %v5941_v30, %v4752_v5  ;;  %v4750_v12 = vpop.permute.xlu1 %4749 }
0x2572   : > { %v4761_v58 = vadd.f32 %v4750_v12, %v4641_v31 }
0x2573   : > { %v4768_v28 = vmul.f32 %v4762_v24, %v7142_v57 }
0x2574   : > { %v4767_v40 = vmul.f32 %v4761_v58, %v7144_v59  ;;  %v4756_v53 = vpop.permute.xlu0 %4755 }
0x2575   : > { %v4754_v11 = vpop.permute.xlu1 %4753  ;;  %v4764_v35 = vadd.f32 %v5944_v34, %v4756_v53 }
0x2576   : > { %v6228_v41 = vpack.c.bf16 %v4768_v28, %v4767_v40  ;;  %v4763_v0 = vadd.f32 %v4754_v11, %v4651_v27 }
0x2577   : > { %v4934_v54 = vsub.f32 1.0, %v4764_v35  ;;  %v4932_v10 = vmul.f32 %v4764_v35, %v7142_v57 }
0x2578   : > { %6229 = vmatprep.subr.bf16.mxu1 %v6228_v41  ;;  %v4933_v56 = vsub.f32 1.0, %v4763_v0  ;;  %v4931_v9 = vmul.f32 %v4763_v0, %v7144_v59 }
0x2579   : > { %6231 = vmatpush3.bf16.msra.mxu1 %v6228_v41 }
0x257a   : > { %6241 = vmatprep.subr.bf16.mxu1 %v6240_v46 }
0x257c   : > { %5960 = vmatmul.mubr.msk.f32.vlgmr.msra.gmra.mrb[62].mxu1 %vm434_vm0, %v6928_v37  ;;  %v4942_v37 = vld [vmem:[%s7239_s10 + $0x18] sm:$0xff] }
0x257d   : > { %v6244_v29 = vpack.c.bf16 %v4942_v37, %v4941_v43  ;;  %6243 = vmatpush3.bf16.msra.mxu1 %v6240_v46 }
0x257f   : > { %6245 = vmatprep.subr.bf16.mxu1 %v6244_v29 }
0x2581   : > { %6247 = vmatpush3.bf16.msra.mxu1 %v6244_v29 }
0x264f   : > { %v5961_v16 = vpop.f32.mrb[62].mxu1 }
0x2650   : > { %v4835_v42 = vpop.f32.mrb[63].mxu1 }
0x2651   : > { %5970 = vmatprep.mubr.msk.f32.mxu0 %vm631_vm1, %v4835_v42 }
0x2652   : > { %5971 = vmatmul.mubr.msk.f32.vlgmr.msra.gmra.mrb[64].mxu0 %vm631_vm1, %v5961_v16 }
0x2725   : > { %v5972_v44 = vpop.f32.mrb[64].mxu0 }
0x2726   : > { %v4926_v48 = vadd.f32 %v5972_v44, %v4766_v3  ;;  %v4916_v51 = vpop.f32.mrb[65].mxu0 }
0x2727   : > { %v4925_v18 = vadd.f32 %v4916_v51, %v4765_v6 }
0x2728   : > { %v4928_v47 = vadd.f32 %v7068_v17, %v4926_v48 }
0x2729   : > { %v4927_v52 = vadd.f32 %v7068_v17, %v4925_v18  ;;  %v5248_v17 = vld [vmem:[%s7240_s11] ss:$0 sm:$0xff] }
0x272a   : > { %6373 = vtanh.f32 %v4928_v47 }
0x272b   : > { %6375 = vtanh.f32 %v4927_v52 }
0x2734   : > { %v6374_v36 = vpop.eup %6373 }
0x2735   : > { %v6376_v49 = vpop.eup %6375  ;;  %v4936_v21 = vmul.f32 %v6374_v36, %v4934_v54 }
0x2736   : > { %v4935_v32 = vmul.f32 %v6376_v49, %v4933_v56 }
0x2737   : > { %v4938_v33 = vadd.f32 %v4936_v21, %v4932_v10 }
0x2738   : > { %v4937_v7 = vadd.f32 %v4935_v32, %v4931_v9 }
0x273a   : > { %5981 = vmatprep.mubr.msk.f32.mxu1 %vm631_vm1, %v4937_v7 }
0x273b   : > { %5982 = vmatmul.mubr.msk.f32.vlgmr.msra.gmra.mrb[64].mxu1 %vm631_vm1, %v4938_v33 }
0x280e   : > { %v5983_v57 = vpop.f32.mrb[64].mxu1 }
0x280f   : > { %v5028_v62 = vadd.f32 %v5983_v57, %v5248_v17  ;;  %v5022_v59 = vpop.f32.mrb[65].mxu1 }
0x2810   : > { %v5023_v8 = vadd.f32 %v5248_v17, %v5022_v59 }
0x2811   : > { %5033 = vst.msk [vmem:[%s413_s23 + $0x8] sm:$0xff] %vm5031_vm2, %v5028_v62 }
0x2812   : > { %5032 = vst.msk [vmem:[%s413_s23] sm:$0xff] %vm5031_vm2, %v5023_v8 }
0x2813 PF: > { %s22_s21 = sadd.s32 1, %s6397_s21  }
0x2814   : > { %p19_p4 = scmp.ge.s32.totalorder %s22_s21, 4  }
0x2816   :  { %21 = sbr.rel (!%p19_p4) target bundleno = 1 (0x1), region = 98 }

</bundles_post_ra>
